<compile_context>
chip_gen: v7x
topology: tpu7x:2x2x1
jax: 0.10.0
libtpu: 0.0.40
codegen_flags: <defaults>
</compile_context>

<pallas_src>
import math

import jax
import jax.numpy as jnp
from jax.experimental import pallas as pl
from jax.experimental.pallas import tpu as pltpu


_BN_EPS = 1e-5
_LRELU_SLOPE = 0.2


def _round_up(x, m):
    return (x + m - 1) // m * m


def _select_tiling():
    # Per-generation tiling: bigger scoped VMEM on v5e/v6e (128 MiB physical),
    # capped on v7x (64 MiB physical, shared HBM between 2 TensorCores).
    try:
        vmem_cap = int(pltpu.get_tpu_info().vmem_capacity_bytes)
    except Exception:  # conservative fallback if the query is unavailable
        vmem_cap = 64 * 1024 * 1024
    vmem_limit = min(96 * 1024 * 1024,
                     max(32 * 1024 * 1024, (vmem_cap * 3) // 4))
    return 1024, vmem_limit


_TM_TARGET, _VMEM_LIMIT = _select_tiling()


# ----------------------------------------------------------------------------
# Pallas kernels
# ----------------------------------------------------------------------------

def _conv_stats_kernel(x_ref, w_ref, y_ref, s_ref, sq_ref):
    # x_ref: (tm, K) bf16 im2col patches.  w_ref: (K, Cout) bf16, VMEM-resident.
    # y_ref: (tm, Cout) bf16 pre-BN activation tile.
    # s_ref / sq_ref: (8, Cout) f32 per-tile partials (row 0 holds the value,
    #   rows 1..7 are zero) -> reduced in the XLA epilogue.  Per-tile partials
    #   keep the M axis fully "parallel" (v7x dual-core friendly).
    # No conv bias (cancels exactly under BatchNorm) and no validity mask
    # (zero-padded rows then contribute exactly 0 to both accumulators).
    y = jnp.dot(x_ref[...], w_ref[...], preferred_element_type=jnp.float32)
    y_ref[...] = y.astype(y_ref.dtype)
    cout = y.shape[1]
    zeros7 = jnp.zeros((7, cout), jnp.float32)
    s_ref[...] = jnp.concatenate(
        [jnp.sum(y, axis=0, keepdims=True), zeros7], axis=0)
    sq_ref[...] = jnp.concatenate(
        [jnp.sum(y * y, axis=0, keepdims=True), zeros7], axis=0)


def _bn_lrelu_kernel(y_ref, scale_ref, shift_ref, o_ref):
    # BN (precomputed scale/shift) + LeakyReLU(0.2); bf16 output for next layer.
    y = y_ref[...].astype(jnp.float32) * scale_ref[...] + shift_ref[...]
    o_ref[...] = jnp.where(y >= 0.0, y, _LRELU_SLOPE * y).astype(o_ref.dtype)


def _bn_lrelu_head_sigmoid_kernel(y_ref, scale_ref, shift_ref, hw_ref, hb_ref,
                                  o_ref):
    # Fused: BN + LeakyReLU + 1x1 conv head (VPU mul + lane reduce) + Sigmoid.
    y = y_ref[...].astype(jnp.float32) * scale_ref[...] + shift_ref[...]
    a = jnp.where(y >= 0.0, y, _LRELU_SLOPE * y)
    z = jnp.sum(a * hw_ref[...], axis=-1, keepdims=True) + hb_ref[...]
    o_ref[...] = (1.0 / (1.0 + jnp.exp(-z))).astype(o_ref.dtype)


def conv_stats(patches, w, *, tm):
    m_pad, k = patches.shape
    cout = w.shape[1]
    n_tiles = m_pad // tm
    return pl.pallas_call(
        _conv_stats_kernel,
        out_shape=(
            jax.ShapeDtypeStruct((m_pad, cout), jnp.bfloat16),      # y (bf16)
            jax.ShapeDtypeStruct((n_tiles * 8, cout), jnp.float32),  # sum parts
            jax.ShapeDtypeStruct((n_tiles * 8, cout), jnp.float32),  # sq parts
        ),
        grid=(n_tiles,),
        in_specs=[
            pl.BlockSpec((tm, k), lambda i: (i, 0)),       # patches: M-tiled
            pl.BlockSpec((k, cout), lambda i: (0, 0)),      # weights: resident
        ],
        out_specs=(
            pl.BlockSpec((tm, cout), lambda i: (i, 0)),     # y: M-tiled
            pl.BlockSpec((8, cout), lambda i: (i, 0)),      # per-tile sum
            pl.BlockSpec((8, cout), lambda i: (i, 0)),      # per-tile sumsq
        ),
        compiler_params=pltpu.CompilerParams(
            dimension_semantics=("parallel",),              # no resident acc
            vmem_limit_bytes=_VMEM_LIMIT),
    )(patches, w)


def bn_lrelu(y, scale, shift, *, tm):
    m_pad, cout = y.shape
    return pl.pallas_call(
        _bn_lrelu_kernel,
        out_shape=jax.ShapeDtypeStruct((m_pad, cout), jnp.bfloat16),
        grid=(m_pad // tm,),
        in_specs=[
            pl.BlockSpec((tm, cout), lambda i: (i, 0)),
            pl.BlockSpec((1, cout), lambda i: (0, 0)),
            pl.BlockSpec((1, cout), lambda i: (0, 0)),
        ],
        out_specs=pl.BlockSpec((tm, cout), lambda i: (i, 0)),
        compiler_params=pltpu.CompilerParams(
            dimension_semantics=("parallel",),
            vmem_limit_bytes=_VMEM_LIMIT),
    )(y, scale, shift)


def bn_lrelu_head_sigmoid(y, scale, shift, head_w, head_b, *, tm):
    m_pad, cout = y.shape
    return pl.pallas_call(
        _bn_lrelu_head_sigmoid_kernel,
        out_shape=jax.ShapeDtypeStruct((m_pad, 1), jnp.float32),
        grid=(m_pad // tm,),
        in_specs=[
            pl.BlockSpec((tm, cout), lambda i: (i, 0)),
            pl.BlockSpec((1, cout), lambda i: (0, 0)),
            pl.BlockSpec((1, cout), lambda i: (0, 0)),
            pl.BlockSpec((1, cout), lambda i: (0, 0)),      # head weight row
            pl.BlockSpec((1, 1), lambda i: (0, 0)),         # head bias
        ],
        out_specs=pl.BlockSpec((tm, 1), lambda i: (i, 0)),
        compiler_params=pltpu.CompilerParams(
            dimension_semantics=("parallel",),
            vmem_limit_bytes=_VMEM_LIMIT),
    )(y, scale, shift, head_w, head_b)


# ----------------------------------------------------------------------------
# Glue: im2col, bilinear interpolation (PyTorch align_corners=False semantics)
# ----------------------------------------------------------------------------

def im2col(x, kh, kw, stride, k_pad):
    # TODO(synk): im2col patch materialization stays in XLA (layout glue);
    # eliminating its HBM blow-up needs halo-window DMA (see header comment).
    n, h, w, c = x.shape
    ho = (h - kh) // stride + 1
    wo = (w - kw) // stride + 1
    cols = []
    for dy in range(kh):
        for dx in range(kw):
            cols.append(x[:, dy:dy + stride * ho:stride,
                          dx:dx + stride * wo:stride, :])
    p = jnp.concatenate(cols, axis=-1)               # (N, Ho, Wo, kh*kw*C)
    k_raw = kh * kw * c
    p = p.reshape(n * ho * wo, k_raw).astype(jnp.bfloat16)
    if k_pad > k_raw:
        p = jnp.pad(p, ((0, 0), (0, k_pad - k_raw)))
    return p, n, ho, wo


def bilinear_resize(x, out_h, out_w):
    # x: (N, H, W, C). Matches F.interpolate(mode='bilinear', align_corners=False).
    n, h, w, c = x.shape

    def src_index(out_size, in_size):
        scale = in_size / out_size
        s = (jnp.arange(out_size, dtype=jnp.float32) + 0.5) * scale - 0.5
        s = jnp.maximum(s, 0.0)
        i0 = jnp.floor(s).astype(jnp.int32)
        i0 = jnp.minimum(i0, in_size - 1)
        i1 = jnp.minimum(i0 + 1, in_size - 1)
        frac = s - i0.astype(jnp.float32)
        return i0, i1, frac

    h0, h1, fh = src_index(out_h, h)
    w0, w1, fw = src_index(out_w, w)

    rows0 = jnp.take(x, h0, axis=1)
    rows1 = jnp.take(x, h1, axis=1)
    fw_b = fw[None, None, :, None]

    def interp_w(rows):
        a = jnp.take(rows, w0, axis=2)
        b = jnp.take(rows, w1, axis=2)
        return a * (1.0 - fw_b) + b * fw_b

    top = interp_w(rows0)
    bot = interp_w(rows1)
    fh_b = fh[None, :, None, None]
    return top * (1.0 - fh_b) + bot * fh_b


# ----------------------------------------------------------------------------
# Parameters (deterministic in-script init; PyTorch Conv2d default-style init)
# ----------------------------------------------------------------------------

def _init_conv(key, cout, cin, kh, kw):
    k1, k2 = jax.random.split(key)
    fan_in = cin * kh * kw
    bound = 1.0 / math.sqrt(fan_in)
    w = jax.random.uniform(k1, (cout, cin, kh, kw), jnp.float32, -bound, bound)
    b = jax.random.uniform(k2, (cout,), jnp.float32, -bound, bound)
    return w, b


def _spectral_normalize(w):
    # TODO(synk): PyTorch spectral_norm does 1 power iteration per forward with
    # a persistent u; here we run the iteration to convergence once at init.
    cout = w.shape[0]
    wm = w.reshape(cout, -1)
    u = jnp.ones((cout,), jnp.float32) / math.sqrt(cout)
    v = None
    for _ in range(30):
        v = wm.T @ u
        v = v / (jnp.linalg.norm(v) + 1e-12)
        u = wm @ v
        u = u / (jnp.linalg.norm(u) + 1e-12)
    sigma = u @ (wm @ v)
    return w / sigma


def _make_net_params(key, base_channels, extra_conv_layers):
    bc = base_channels
    specs = [(3, bc, 3, 1), (bc, bc * 2, 3, 2), (bc * 2, bc * 2, 3, 1)]
    for _ in range(extra_conv_layers):
        specs.append((bc * 2, bc * 2, 3, 1))

    convs = []
    for cin, cout, k, stride in specs:
        key, sub = jax.random.split(key)
        w, _b = _init_conv(sub, cout, cin, k, k)
        # NOTE: the conv bias _b is generated but unused: every conv here is
        # followed by BatchNorm2d, under which the bias cancels exactly.
        w = _spectral_normalize(w)
        k_raw = k * k * cin
        k_pad = _round_up(k_raw, 16)        # bf16 sublane packing (2 rows/sublane)
        # (Cout, Cin, kh, kw) -> (kh*kw*Cin, Cout), matching im2col K ordering
        wmat = jnp.transpose(w, (2, 3, 1, 0)).reshape(k_raw, cout)
        if k_pad > k_raw:
            wmat = jnp.pad(wmat, ((0, k_pad - k_raw), (0, 0)))
        convs.append(dict(
            w=wmat.astype(jnp.bfloat16),
            gamma=jnp.ones((1, cout), jnp.float32),
            beta=jnp.zeros((1, cout), jnp.float32),
            kh=k, kw=k, stride=stride, k_pad=k_pad))

    key, sub = jax.random.split(key)
    hw, hb = _init_conv(sub, 1, bc * 2, 1, 1)
    hw = _spectral_normalize(hw)
    head_w = hw.reshape(1, bc * 2).astype(jnp.float32)   # row vector over Cout
    head_b = hb.reshape(1, 1).astype(jnp.float32)        # no BN after head -> keep bias
    return dict(convs=convs, head_w=head_w, head_b=head_b), key


def _run_net(x, net):
    # x: (N, H, W, C) NHWC -> (N, Ho, Wo, 1)
    convs = net["convs"]
    n_convs = len(convs)
    for li, layer in enumerate(convs):
        patches, n, ho, wo = im2col(x, layer["kh"], layer["kw"],
                                    layer["stride"], layer["k_pad"])
        m = n * ho * wo
        cout = layer["w"].shape[1]
        tm = min(_TM_TARGET, _round_up(m, 8))
        m_pad = _round_up(m, tm)
        if m_pad > m:
            patches = jnp.pad(patches, ((0, m_pad - m), (0, 0)))

        # Pass A: matmul (no bias) + per-tile partial per-channel stats.
        y, s_parts, sq_parts = conv_stats(patches, layer["w"], tm=tm)

        # Tiny cross-tile reduction in XLA; exact BatchNorm2d training stats
        # (biased variance over the real (N,H,W) rows only — padded rows are 0).
        s = jnp.sum(s_parts, axis=0, keepdims=True)
        sq = jnp.sum(sq_parts, axis=0, keepdims=True)
        mean = s / float(m)
        var = jnp.maximum(sq / float(m) - mean * mean, 0.0)
        scale = layer["gamma"] * jax.lax.rsqrt(var + _BN_EPS)
        shift = layer["beta"] - mean * scale

        # Pass B: normalize + LeakyReLU (+ fused 1x1 head + sigmoid on last).
        if li == n_convs - 1:
            out = bn_lrelu_head_sigmoid(y, scale, shift, net["head_w"],
                                        net["head_b"], tm=tm)
            x = out[:m].reshape(n, ho, wo, 1)
        else:
            out = bn_lrelu(y, scale, shift, tm=tm)
            x = out[:m].reshape(n, ho, wo, cout)
    return x


# ----------------------------------------------------------------------------
# The module
# ----------------------------------------------------------------------------

class MultiScaleDiscriminatorPallas:
    def __init__(self, real_crop_size, key, max_n_scales=9, scale_factor=2,
                 base_channels=128, extra_conv_layers=0):
        self.scale_factor = scale_factor
        self.min_size = 16
        self.max_n_scales = int(min(
            int(math.ceil(math.log(min(real_crop_size) * 1.0 / self.min_size)
                          / math.log(scale_factor))),
            max_n_scales))
        self.nets = []
        for _ in range(self.max_n_scales):
            net, key = _make_net_params(key, base_channels, extra_conv_layers)
            self.nets.append(net)

    def __call__(self, input_tensor_nchw, scale_weights):
        x = jnp.transpose(input_tensor_nchw, (0, 2, 3, 1)).astype(jnp.float32)
        agg = _run_net(x, self.nets[0]) * scale_weights[0]
        map_h, map_w = agg.shape[1], agg.shape[2]
        n_scales = min(len(self.nets), int(scale_weights.shape[0]))
        for i in range(1, n_scales):
            sf = self.scale_factor ** (-i)
            oh = int(math.floor(x.shape[1] * sf))
            ow = int(math.floor(x.shape[2] * sf))
            xi = bilinear_resize(x, oh, ow)
            rm = _run_net(xi, self.nets[i])
            rm_up = bilinear_resize(rm, map_h, map_w)
            agg = agg + rm_up * scale_weights[i]
        # back to NCHW: (N, 1, Hout, Wout)
        return jnp.transpose(agg, (0, 3, 1, 2))


# ----------------------------------------------------------------------------
# main
# ----------------------------------------------------------------------------

if __name__ == "__main__":
    key = jax.random.PRNGKey(0)
    kx, kparams = jax.random.split(key)

    batch, h, w = 2, 64, 64                      # -> max_n_scales = 2
    x = jax.random.normal(kx, (batch, 3, h, w), dtype=jnp.float32)
    scale_weights = jnp.array([0.6, 0.4], dtype=jnp.float32)

    disc = MultiScaleDiscriminatorPallas((h, w), kparams,
                                         base_channels=8, extra_conv_layers=0)
    assert disc.max_n_scales == 2

    out = disc(x, scale_weights)
    out = jax.block_until_ready(out)

    # Conv chain at full scale: 64 -> 62 -> 30 -> 28 -> 28 (fused 1x1 head)
    assert out.shape == (batch, 1, 28, 28), out.shape
    assert bool(jnp.all(jnp.isfinite(out)))
    print("KERNEL_OK")
</pallas_src>

<mosaic_0001>
module attributes {stable_mosaic.version = 11 : i64} {
  func.func @_conv_stats_kernel(%arg0: i32, %arg1: memref<1024x32xbf16, #tpu.memory_space<vmem>>, %arg2: memref<32x8xbf16, #tpu.memory_space<vmem>>, %arg3: memref<1024x8xbf16, #tpu.memory_space<vmem>>, %arg4: memref<8x8xf32, #tpu.memory_space<vmem>>, %arg5: memref<8x8xf32, #tpu.memory_space<vmem>>) attributes {dimension_semantics = [#tpu.dimension_semantics<parallel>], iteration_bounds = array<i64: 8>, scalar_prefetch = 0 : i64, scratch_operands = 0 : i64, tpu.core_type = #tpu.core_type<tc>, window_params = [{transform_indices = @transform_0, window_bounds = array<i64: 1024, 32>}, {pipeline_mode = #tpu.pipeline_mode<synchronous>, transform_indices = @transform_1, window_bounds = array<i64: 32, 8>}, {transform_indices = @transform_2, window_bounds = array<i64: 1024, 8>}, {transform_indices = @transform_3, window_bounds = array<i64: 8, 8>}, {transform_indices = @transform_4, window_bounds = array<i64: 8, 8>}]} {
    %c0 = arith.constant 0 : index
    %c0_0 = arith.constant 0 : index
    %0 = vector.load %arg1[%c0, %c0_0] : memref<1024x32xbf16, #tpu.memory_space<vmem>>, vector<1024x32xbf16>
    %c0_1 = arith.constant 0 : index
    %c0_2 = arith.constant 0 : index
    %1 = vector.load %arg2[%c0_1, %c0_2] : memref<32x8xbf16, #tpu.memory_space<vmem>>, vector<32x8xbf16>
    %cst = arith.constant dense<0.000000e+00> : vector<1024x8xf32>
    %2 = tpu.matmul %0, %1, %cst {dimension_numbers = #tpu.dot_dimension_numbers<[1], [0], [0], [1], [0, 0, 1, 1], [], []>} : vector<1024x32xbf16>, vector<32x8xbf16>, vector<1024x8xf32> -> vector<1024x8xf32>
    %3 = arith.truncf %2 : vector<1024x8xf32> to vector<1024x8xbf16>
    %c0_3 = arith.constant 0 : index
    %c0_4 = arith.constant 0 : index
    %4 = vector.load %arg3[%c0_3, %c0_4] : memref<1024x8xbf16, #tpu.memory_space<vmem>>, vector<1024x8xbf16>
    tpu.vector_store %arg3[%c0_3, %c0_4], %3 {strides = array<i32>} : memref<1024x8xbf16, #tpu.memory_space<vmem>>, vector<1024x8xbf16>,
    %cst_5 = arith.constant 0.000000e+00 : f32
    %5 = vector.broadcast %cst_5 : f32 to vector<7x8xf32>
    %cst_6 = arith.constant dense<0.000000e+00> : vector<8xf32>
    %6 = vector.multi_reduction <add>, %2, %cst_6 [0] : vector<1024x8xf32> to vector<8xf32>
    %7 = vector.shape_cast %6 : vector<8xf32> to vector<1x8xf32>
    %8 = tpu.concatenate %7, %5 in 0 : vector<1x8xf32>, vector<7x8xf32> -> vector<8x8xf32>
    %c0_7 = arith.constant 0 : index
    %c0_8 = arith.constant 0 : index
    %9 = vector.load %arg4[%c0_7, %c0_8] : memref<8x8xf32, #tpu.memory_space<vmem>>, vector<8x8xf32>
    tpu.vector_store %arg4[%c0_7, %c0_8], %8 {strides = array<i32>} : memref<8x8xf32, #tpu.memory_space<vmem>>, vector<8x8xf32>,
    %10 = arith.mulf %2, %2 : vector<1024x8xf32>
    %cst_9 = arith.constant dense<0.000000e+00> : vector<8xf32>
    %11 = vector.multi_reduction <add>, %10, %cst_9 [0] : vector<1024x8xf32> to vector<8xf32>
    %12 = vector.shape_cast %11 : vector<8xf32> to vector<1x8xf32>
    %13 = tpu.concatenate %12, %5 in 0 : vector<1x8xf32>, vector<7x8xf32> -> vector<8x8xf32>
    %c0_10 = arith.constant 0 : index
    %c0_11 = arith.constant 0 : index
    %14 = vector.load %arg5[%c0_10, %c0_11] : memref<8x8xf32, #tpu.memory_space<vmem>>, vector<8x8xf32>
    tpu.vector_store %arg5[%c0_10, %c0_11], %13 {strides = array<i32>} : memref<8x8xf32, #tpu.memory_space<vmem>>, vector<8x8xf32>,
    return
  }
  func.func @transform_0(%arg0: i32) -> (i32, i32) {
    %c0_i32 = arith.constant 0 : i32
    %c0_i32_0 = arith.constant 0 : i32
    return %arg0, %c0_i32 : i32, i32
  }
  func.func @transform_1(%arg0: i32) -> (i32, i32) {
    %c0_i32 = arith.constant 0 : i32
    %c0_i32_0 = arith.constant 0 : i32
    %c0_i32_1 = arith.constant 0 : i32
    return %c0_i32, %c0_i32_0 : i32, i32
  }
  func.func @transform_2(%arg0: i32) -> (i32, i32) {
    %c0_i32 = arith.constant 0 : i32
    %c0_i32_0 = arith.constant 0 : i32
    return %arg0, %c0_i32 : i32, i32
  }
  func.func @transform_3(%arg0: i32) -> (i32, i32) {
    %c0_i32 = arith.constant 0 : i32
    %c0_i32_0 = arith.constant 0 : i32
    return %arg0, %c0_i32 : i32, i32
  }
  func.func @transform_4(%arg0: i32) -> (i32, i32) {
    %c0_i32 = arith.constant 0 : i32
    %c0_i32_0 = arith.constant 0 : i32
    return %arg0, %c0_i32 : i32, i32
  }
}

</mosaic_0001>

<bundles_post_ra>
// kernel: tpu_custom_call.1
= control target key start
LH: loop header
LB: loop body
LE: loop exit
PB: predicated region body
PF: predicated region fallthrough
CT: control target
= control target key end

     0   :  { %s3548_s15 = smov 0   ;;  %s4683_s0 = inlined_call_operand.vmem [shape: bf16[8192,32], index: 0, kind: input, shape index: {}]   ;;  %s4684_s1 = inlined_call_operand.vmem [shape: bf16[32,8], index: 1, kind: input, shape index: {}]   ;;  %s4685_s2 = inlined_call_operand.vmem [shape: bf16[8192,8], index: 2, kind: output, shape index: {0}]   ;;  %s4686_s3 = inlined_call_operand.vmem [shape: f32[64,8], index: 3, kind: output, shape index: {1}]   ;;  %s4687_s4 = inlined_call_operand.vmem [shape: f32[64,8], index: 4, kind: output, shape index: {2}]  }
   0x1 LB: > { %s3554_s16 = sadd.s32 4294967295, %s3521_s15   ;;  %p2844_p0 = scmp.ge.s32.totalorder %s3521_s15, 1  ;;  %s3521_s15 = sphi %s3548_s15, %s15_s15  }
   0x2   : > { %p168_p1 = scmp.lt.s32.totalorder %s3521_s15, 9 }
   0x4   : > { %p169_p2 = pnand %p2844_p0, %p168_p1 }
   0x6   : > { %172 = sbr.rel (%p169_p2) target bundleno = 508 (0x1fc), region = 28 }
   0xd   : > { %v3449_v0 = vld [vmem:[%s4684_s1] sm:$0xff]   ;;  %s2845_s19 = sshll.u32 %s3554_s16, 7  ;;  %v3450_v1 = vld [vmem:[%s4684_s1 + $0x8] sm:$0xff]   ;;  %vm687_vm0 = vcmask 261120   ;;  %vm1937_vm1 = vcmask 60416   ;;  %vm2066_vm2 = vcmask 64512  }
   0xe   : > { %p203_p3 = scmp.lt.s32.totalorder %s2845_s19, 1023  ;;  %3305 = vmatprep.subr.bf16.mxu0 %v3449_v0  ;;  %3437 = vmatprep.subr.bf16.mxu1 %v3449_v0  ;;  %p214_p4 = scmp.lt.s32.totalorder %s3554_s16, 7  ;;  %vm2328_vm3 = vcmask 1040384  }
   0xf   : > { %3306 = vmatpush3.bf16.msra.mxu0 %v3449_v0  ;;  %3439 = vmatpush3.bf16.msra.mxu1 %v3449_v0 }
  0x10   : > { %s4705_s19 = smov (!%p203_p3, %s2845_s19), 1023  ;;  %3307 = vmatprep.subr.bf16.mxu0 %v3450_v1  ;;  %3438 = vmatprep.subr.bf16.mxu1 %v3450_v1  ;;  %s4707_s16 = smov (!%p214_p4, %s3554_s16), 7 }
  0x11   : > { %s2846_s22 = sshll.u32 %s4705_s19, 2  ;;  %s2849_s29 = sshll.u32 %s4707_s16, 3 }
  0x12   : > { %s3573_s25 = scalar_lea.vmem %s4683_s0, %s2846_s22  ;;  %s3708_s28 = scalar_lea.vmem %s4685_s2, %s2846_s22 }
  0x13   : > { %3308 = vmatpush3.bf16.msra.mxu0 %v3450_v1  ;;  %v3451_v2 = vld [vmem:[%s3573_s25] sm:$0xff]   ;;  %3440 = vmatpush3.bf16.msra.mxu1 %v3450_v1  ;;  %v3452_v3 = vld [vmem:[%s3573_s25 + $0x8] sm:$0xff]   ;;  %v3453_v4 = vld [vmem:[%s3573_s25 + $0x10] sm:$0xff]   ;;  %s217_s6 = scalar_lea.vmem %s4686_s3, %s2849_s29  ;;  %s221_s9 = scalar_lea.vmem %s4687_s4, %s2849_s29 }
  0x14   : > { %3309 = vmatprep.mubr.msk.bf16.mxu0 %vm687_vm0, %v3451_v2  ;;  %v3454_v5 = vld [vmem:[%s3573_s25 + $0x18] sm:$0xff]   ;;  %v3455_v6 = vld [vmem:[%s3573_s25 + $0x20] sm:$0xff]   ;;  %v3456_v7 = vld [vmem:[%s3573_s25 + $0x28] sm:$0xff]  }
  0x15   : > { %v3457_v8 = vld [vmem:[%s3573_s25 + $0x30] sm:$0xff]   ;;  %v3458_v9 = vld [vmem:[%s3573_s25 + $0x38] sm:$0xff]   ;;  %v3459_v10 = vld [vmem:[%s3573_s25 + $0x40] sm:$0xff]  }
  0x16   : > { %3310 = vmatmul.mubr.msk.bf16.vlgmr.msra.gmra.mrb[0].mxu0 %vm687_vm0, %v3452_v3  ;;  %v3460_v11 = vld [vmem:[%s3573_s25 + $0x48] sm:$0xff]   ;;  %v3461_v12 = vld [vmem:[%s3573_s25 + $0x50] sm:$0xff]   ;;  %v3483_v13 = vld [vmem:[%s3573_s25 + $0x100] sm:$0xff]  }
  0x17   : > { %3313 = vmatprep.mubr.msk.bf16.mxu0 %vm687_vm0, %v3453_v4  ;;  %v3484_v14 = vld [vmem:[%s3573_s25 + $0x108] sm:$0xff]   ;;  %3373 = vmatprep.mubr.msk.bf16.mxu1 %vm687_vm0, %v3483_v13  ;;  %v3485_v15 = vld [vmem:[%s3573_s25 + $0x110] sm:$0xff]   ;;  %v3462_v16 = vld [vmem:[%s3573_s25 + $0x58] sm:$0xff]  }
  0x18   : > { %3374 = vmatmul.mubr.msk.bf16.vlgmr.msra.gmra.mrb[0].mxu1 %vm687_vm0, %v3484_v14  ;;  %v3463_v17 = vld [vmem:[%s3573_s25 + $0x60] sm:$0xff]   ;;  %v3486_v18 = vld [vmem:[%s3573_s25 + $0x118] sm:$0xff]   ;;  %v3464_v20 = vld [vmem:[%s3573_s25 + $0x68] sm:$0xff]  }
  0x19   : > { %3377 = vmatprep.mubr.msk.bf16.mxu1 %vm687_vm0, %v3485_v15  ;;  %v3487_v19 = vld [vmem:[%s3573_s25 + $0x120] sm:$0xff]   ;;  %v3465_v21 = vld [vmem:[%s3573_s25 + $0x70] sm:$0xff]   ;;  %v3488_v22 = vld [vmem:[%s3573_s25 + $0x128] sm:$0xff]  }
  0x1a   : > { %v3489_v23 = vld [vmem:[%s3573_s25 + $0x130] sm:$0xff]   ;;  %v3466_v24 = vld [vmem:[%s3573_s25 + $0x78] sm:$0xff]   ;;  %v3467_v26 = vld [vmem:[%s3573_s25 + $0x80] sm:$0xff]  }
  0x1b   : > { %v3490_v25 = vld [vmem:[%s3573_s25 + $0x138] sm:$0xff]   ;;  %v3491_v27 = vld [vmem:[%s3573_s25 + $0x140] sm:$0xff]   ;;  %v3468_v28 = vld [vmem:[%s3573_s25 + $0x88] sm:$0xff]  }
  0x1c   : > { %v3492_v29 = vld [vmem:[%s3573_s25 + $0x148] sm:$0xff]   ;;  %v3469_v30 = vld [vmem:[%s3573_s25 + $0x90] sm:$0xff]   ;;  %v3470_v32 = vld [vmem:[%s3573_s25 + $0x98] sm:$0xff]  }
  0x1d   : > { %v3493_v31 = vld [vmem:[%s3573_s25 + $0x150] sm:$0xff]   ;;  %v3494_v33 = vld [vmem:[%s3573_s25 + $0x158] sm:$0xff]   ;;  %v3471_v34 = vld [vmem:[%s3573_s25 + $0xa0] sm:$0xff]  }
  0x1e   : > { %3314 = vmatmul.mubr.msk.bf16.gmra.mrb[4].mxu0 %vm687_vm0, %v3454_v5  ;;  %v3495_v35 = vld [vmem:[%s3573_s25 + $0x160] sm:$0xff]   ;;  %v3472_v36 = vld [vmem:[%s3573_s25 + $0xa8] sm:$0xff]   ;;  %v3473_v38 = vld [vmem:[%s3573_s25 + $0xb0] sm:$0xff]  }
  0x1f   : > { %3317 = vmatprep.mubr.msk.bf16.mxu0 %vm687_vm0, %v3455_v6  ;;  %v3496_v37 = vld [vmem:[%s3573_s25 + $0x168] sm:$0xff]   ;;  %v3497_v39 = vld [vmem:[%s3573_s25 + $0x170] sm:$0xff]   ;;  %v3474_v40 = vld [vmem:[%s3573_s25 + $0xb8] sm:$0xff]  }
  0x20   : > { %3378 = vmatmul.mubr.msk.bf16.gmra.mrb[4].mxu1 %vm687_vm0, %v3486_v18  ;;  %v3498_v41 = vld [vmem:[%s3573_s25 + $0x178] sm:$0xff]   ;;  %v3475_v42 = vld [vmem:[%s3573_s25 + $0xc0] sm:$0xff]   ;;  %v3476_v44 = vld [vmem:[%s3573_s25 + $0xc8] sm:$0xff]  }
  0x21   : > { %3381 = vmatprep.mubr.msk.bf16.mxu1 %vm687_vm0, %v3487_v19  ;;  %v3499_v43 = vld [vmem:[%s3573_s25 + $0x180] sm:$0xff]   ;;  %v3500_v45 = vld [vmem:[%s3573_s25 + $0x188] sm:$0xff]   ;;  %v3477_v46 = vld [vmem:[%s3573_s25 + $0xd0] sm:$0xff]  }
  0x22   : > { %v3501_v47 = vld [vmem:[%s3573_s25 + $0x190] sm:$0xff]   ;;  %v3478_v48 = vld [vmem:[%s3573_s25 + $0xd8] sm:$0xff]   ;;  %v3479_v50 = vld [vmem:[%s3573_s25 + $0xe0] sm:$0xff]  }
  0x23   : > { %v3502_v49 = vld [vmem:[%s3573_s25 + $0x198] sm:$0xff]   ;;  %v3503_v51 = vld [vmem:[%s3573_s25 + $0x1a0] sm:$0xff]   ;;  %v3480_v52 = vld [vmem:[%s3573_s25 + $0xe8] sm:$0xff]  }
  0x24   : > { %v3504_v53 = vld [vmem:[%s3573_s25 + $0x1a8] sm:$0xff]   ;;  %v3481_v54 = vld [vmem:[%s3573_s25 + $0xf0] sm:$0xff]   ;;  %v3482_v56 = vld [vmem:[%s3573_s25 + $0xf8] sm:$0xff]  }
  0x25   : > { %v3505_v55 = vld [vmem:[%s3573_s25 + $0x1b0] sm:$0xff]   ;;  %v3506_v57 = vld [vmem:[%s3573_s25 + $0x1b8] sm:$0xff]   ;;  %v3507_v58 = vld [vmem:[%s3573_s25 + $0x1c0] sm:$0xff]  }
  0x26   : > { %3318 = vmatmul.mubr.msk.bf16.gmra.mrb[8].mxu0 %vm687_vm0, %v3456_v7  ;;  %v3508_v59 = vld [vmem:[%s3573_s25 + $0x1c8] sm:$0xff]   ;;  %v3509_v60 = vld [vmem:[%s3573_s25 + $0x1d0] sm:$0xff]   ;;  %v3510_v61 = vld [vmem:[%s3573_s25 + $0x1d8] sm:$0xff]  }
  0x27   : > { %3321 = vmatprep.mubr.msk.bf16.mxu0 %vm687_vm0, %v3457_v8  ;;  %v3511_v62 = vld [vmem:[%s3573_s25 + $0x1e0] sm:$0xff]   ;;  %v3512_v63 = vld [vmem:[%s3573_s25 + $0x1e8] sm:$0xff]   ;;  %v3513_v0 = vld [vmem:[%s3573_s25 + $0x1f0] sm:$0xff]  }
  0x28   : > { %3382 = vmatmul.mubr.msk.bf16.gmra.mrb[8].mxu1 %vm687_vm0, %v3488_v22  ;;  %v3514_v1 = vld [vmem:[%s3573_s25 + $0x1f8] sm:$0xff]  }
  0x29   : > { %3385 = vmatprep.mubr.msk.bf16.mxu1 %vm687_vm0, %v3489_v23 }
  0x2e   : > { %3322 = vmatmul.mubr.msk.bf16.gmra.mrb[12].mxu0 %vm687_vm0, %v3458_v9 }
  0x2f   : > { %3325 = vmatprep.mubr.msk.bf16.mxu0 %vm687_vm0, %v3459_v10 }
  0x30   : > { %3386 = vmatmul.mubr.msk.bf16.gmra.mrb[12].mxu1 %vm687_vm0, %v3490_v25 }
  0x31   : > { %3389 = vmatprep.mubr.msk.bf16.mxu1 %vm687_vm0, %v3491_v27 }
  0x36   : > { %3326 = vmatmul.mubr.msk.bf16.gmra.mrb[16].mxu0 %vm687_vm0, %v3460_v11 }
  0x37   : > { %3329 = vmatprep.mubr.msk.bf16.mxu0 %vm687_vm0, %v3461_v12 }
  0x38   : > { %3390 = vmatmul.mubr.msk.bf16.gmra.mrb[16].mxu1 %vm687_vm0, %v3492_v29 }
  0x39   : > { %3393 = vmatprep.mubr.msk.bf16.mxu1 %vm687_vm0, %v3493_v31 }
  0x3e   : > { %3330 = vmatmul.mubr.msk.bf16.gmra.mrb[20].mxu0 %vm687_vm0, %v3462_v16 }
  0x3f   : > { %3333 = vmatprep.mubr.msk.bf16.mxu0 %vm687_vm0, %v3463_v17 }
  0x40   : > { %3394 = vmatmul.mubr.msk.bf16.gmra.mrb[20].mxu1 %vm687_vm0, %v3494_v33 }
  0x41   : > { %3397 = vmatprep.mubr.msk.bf16.mxu1 %vm687_vm0, %v3495_v35 }
  0x46   : > { %3334 = vmatmul.mubr.msk.bf16.gmra.mrb[24].mxu0 %vm687_vm0, %v3464_v20 }
  0x47   : > { %3337 = vmatprep.mubr.msk.bf16.mxu0 %vm687_vm0, %v3465_v21 }
  0x48   : > { %3398 = vmatmul.mubr.msk.bf16.gmra.mrb[24].mxu1 %vm687_vm0, %v3496_v37 }
  0x49   : > { %3401 = vmatprep.mubr.msk.bf16.mxu1 %vm687_vm0, %v3497_v39 }
  0x4e   : > { %3338 = vmatmul.mubr.msk.bf16.gmra.mrb[28].mxu0 %vm687_vm0, %v3466_v24 }
  0x4f   : > { %3341 = vmatprep.mubr.msk.bf16.mxu0 %vm687_vm0, %v3467_v26 }
  0x50   : > { %3402 = vmatmul.mubr.msk.bf16.gmra.mrb[28].mxu1 %vm687_vm0, %v3498_v41 }
  0x51   : > { %3405 = vmatprep.mubr.msk.bf16.mxu1 %vm687_vm0, %v3499_v43 }
  0x56   : > { %3342 = vmatmul.mubr.msk.bf16.gmra.mrb[32].mxu0 %vm687_vm0, %v3468_v28 }
  0x57   : > { %3345 = vmatprep.mubr.msk.bf16.mxu0 %vm687_vm0, %v3469_v30 }
  0x58   : > { %3406 = vmatmul.mubr.msk.bf16.gmra.mrb[32].mxu1 %vm687_vm0, %v3500_v45 }
  0x59   : > { %3409 = vmatprep.mubr.msk.bf16.mxu1 %vm687_vm0, %v3501_v47 }
  0x5e   : > { %3346 = vmatmul.mubr.msk.bf16.gmra.mrb[36].mxu0 %vm687_vm0, %v3470_v32 }
  0x5f   : > { %3349 = vmatprep.mubr.msk.bf16.mxu0 %vm687_vm0, %v3471_v34 }
  0x60   : > { %3410 = vmatmul.mubr.msk.bf16.gmra.mrb[36].mxu1 %vm687_vm0, %v3502_v49 }
  0x61   : > { %3413 = vmatprep.mubr.msk.bf16.mxu1 %vm687_vm0, %v3503_v51 }
  0x66   : > { %3350 = vmatmul.mubr.msk.bf16.gmra.mrb[40].mxu0 %vm687_vm0, %v3472_v36 }
  0x67   : > { %3353 = vmatprep.mubr.msk.bf16.mxu0 %vm687_vm0, %v3473_v38 }
  0x68   : > { %3414 = vmatmul.mubr.msk.bf16.gmra.mrb[40].mxu1 %vm687_vm0, %v3504_v53 }
  0x69   : > { %3417 = vmatprep.mubr.msk.bf16.mxu1 %vm687_vm0, %v3505_v55 }
  0x6e   : > { %3354 = vmatmul.mubr.msk.bf16.gmra.mrb[44].mxu0 %vm687_vm0, %v3474_v40 }
  0x6f   : > { %3357 = vmatprep.mubr.msk.bf16.mxu0 %vm687_vm0, %v3475_v42 }
  0x70   : > { %3418 = vmatmul.mubr.msk.bf16.gmra.mrb[44].mxu1 %vm687_vm0, %v3506_v57 }
  0x71   : > { %3421 = vmatprep.mubr.msk.bf16.mxu1 %vm687_vm0, %v3507_v58 }
  0x76   : > { %3358 = vmatmul.mubr.msk.bf16.gmra.mrb[48].mxu0 %vm687_vm0, %v3476_v44 }
  0x77   : > { %3361 = vmatprep.mubr.msk.bf16.mxu0 %vm687_vm0, %v3477_v46 }
  0x78   : > { %3422 = vmatmul.mubr.msk.bf16.gmra.mrb[48].mxu1 %vm687_vm0, %v3508_v59 }
  0x79   : > { %3425 = vmatprep.mubr.msk.bf16.mxu1 %vm687_vm0, %v3509_v60 }
  0x7e   : > { %3362 = vmatmul.mubr.msk.bf16.gmra.mrb[52].mxu0 %vm687_vm0, %v3478_v48 }
  0x7f   : > { %3365 = vmatprep.mubr.msk.bf16.mxu0 %vm687_vm0, %v3479_v50 }
  0x80   : > { %3426 = vmatmul.mubr.msk.bf16.gmra.mrb[52].mxu1 %vm687_vm0, %v3510_v61 }
  0x81   : > { %3429 = vmatprep.mubr.msk.bf16.mxu1 %vm687_vm0, %v3511_v62 }
  0x86   : > { %3366 = vmatmul.mubr.msk.bf16.gmra.mrb[56].mxu0 %vm687_vm0, %v3480_v52 }
  0x87   : > { %3369 = vmatprep.mubr.msk.bf16.mxu0 %vm687_vm0, %v3481_v54 }
  0x88   : > { %3430 = vmatmul.mubr.msk.bf16.gmra.mrb[56].mxu1 %vm687_vm0, %v3512_v63 }
  0x89   : > { %3433 = vmatprep.mubr.msk.bf16.mxu1 %vm687_vm0, %v3513_v0 }
  0x8e   : > { %3370 = vmatmul.mubr.msk.bf16.gmra.mrb[60].mxu0 %vm687_vm0, %v3482_v56 }
  0x90   : > { %3434 = vmatmul.mubr.msk.bf16.gmra.mrb[60].mxu1 %vm687_vm0, %v3514_v1 }
  0xe9   : > { %v3311_v2 = vpop.f32.mrb[0].mxu0 }
  0xea   : > { %v3113_v3 = vpack.c.bf16 %v3311_v2, %v3311_v2  ;;  %v914_v4 = vpop.f32.mrb[1].mxu0  ;;  %v2333_v8 = vmul.f32 %v3311_v2, %v3311_v2  ;;  %v2070_v17 = vsel %vm2066_vm2, %v3311_v2, 0.0 }
  0xeb   : > { %v3111_v5 = vpack.c.bf16 %v914_v4, %v914_v4  ;;  %v2331_v6 = vmul.f32 %v914_v4, %v914_v4  ;;  %v3312_v7 = vpop.f32.mrb[2].mxu0  ;;  %v2067_v11 = vsel %vm2066_vm2, %v914_v4, 0.0 }
  0xec   : > { %1940 = vst.msk [vmem:[%s3708_s28 + $0x8] sm:$0xf] %vm1937_vm1, %v3113_v3  ;;  %v3114_v9 = vpack.c.bf16 %v3312_v7, %v3312_v7  ;;  %v917_v10 = vpop.f32.mrb[3].mxu0  ;;  %v2334_v15 = vmul.f32 %v3312_v7, %v3312_v7  ;;  %v2462_v22 = vsel %vm2066_vm2, %v2333_v8, 0.0  ;;  %v2072_v24 = vsel %vm2066_vm2, %v3312_v7, 0.0 }
  0xed   : > { %1938 = vst.msk [vmem:[%s3708_s28] sm:$0xf] %vm1937_vm1, %v3111_v5  ;;  %v3112_v12 = vpack.c.bf16 %v917_v10, %v917_v10  ;;  %v2068_v13 = vsel %vm2066_vm2, %v917_v10, 0.0  ;;  %v2332_v14 = vmul.f32 %v917_v10, %v917_v10  ;;  %v2459_v18 = vsel %vm2066_vm2, %v2331_v6, 0.0 }
  0xee   : > { %1941 = vst.msk [vmem:[%s3708_s28 + $0xc] sm:$0xf] %vm1937_vm1, %v3114_v9  ;;  %v2069_v16 = vadd.f32 %v2068_v13, %v2067_v11  ;;  %v2464_v25 = vsel %vm2066_vm2, %v2334_v15, 0.0 }
  0xef   : > { %1939 = vst.msk [vmem:[%s3708_s28 + $0x4] sm:$0xf] %vm1937_vm1, %v3112_v12  ;;  %v2460_v19 = vsel %vm2066_vm2, %v2332_v14, 0.0 }
  0xf0   : > { %v2071_v20 = vadd.f32 %v2070_v17, %v2069_v16  ;;  %v2461_v21 = vadd.f32 %v2460_v19, %v2459_v18 }
  0xf1   : > { %v3315_v23 = vpop.f32.mrb[4].mxu0 }
  0xf2   : > { %v2463_v26 = vadd.f32 %v2462_v22, %v2461_v21  ;;  %v3117_v27 = vpack.c.bf16 %v3315_v23, %v3315_v23  ;;  %v930_v28 = vpop.f32.mrb[5].mxu0  ;;  %v2073_v30 = vadd.f32 %v2072_v24, %v2071_v20  ;;  %v2337_v40 = vmul.f32 %v3315_v23, %v3315_v23 }
  0xf3   : > { %v3115_v29 = vpack.c.bf16 %v930_v28, %v930_v28  ;;  %v2074_v31 = vsel %vm2066_vm2, %v930_v28, 0.0  ;;  %v2335_v32 = vmul.f32 %v930_v28, %v930_v28  ;;  %v3316_v33 = vpop.f32.mrb[6].mxu0  ;;  %v2078_v45 = vsel %vm2066_vm2, %v3315_v23, 0.0 }
  0xf4   : > { %1944 = vst.msk [vmem:[%s3708_s28 + $0x18] sm:$0xf] %vm1937_vm1, %v3117_v27  ;;  %v2465_v34 = vadd.f32 %v2464_v25, %v2463_v26  ;;  %v3118_v35 = vpack.c.bf16 %v3316_v33, %v3316_v33  ;;  %v933_v36 = vpop.f32.mrb[7].mxu0  ;;  %v2075_v37 = vadd.f32 %v2074_v31, %v2073_v30  ;;  %v2338_v46 = vmul.f32 %v3316_v33, %v3316_v33 }
  0xf5   : > { %1942 = vst.msk [vmem:[%s3708_s28 + $0x10] sm:$0xf] %vm1937_vm1, %v3115_v29  ;;  %v2466_v38 = vsel %vm2066_vm2, %v2335_v32, 0.0  ;;  %v3116_v39 = vpack.c.bf16 %v933_v36, %v933_v36  ;;  %v2076_v42 = vsel %vm2066_vm2, %v933_v36, 0.0  ;;  %v2336_v43 = vmul.f32 %v933_v36, %v933_v36 }
  0xf6   : > { %v2467_v41 = vadd.f32 %v2466_v38, %v2465_v34  ;;  %1945 = vst.msk [vmem:[%s3708_s28 + $0x1c] sm:$0xf] %vm1937_vm1, %v3118_v35  ;;  %v2077_v44 = vadd.f32 %v2076_v42, %v2075_v37  ;;  %v2470_v51 = vsel %vm2066_vm2, %v2337_v40, 0.0  ;;  %v2080_v52 = vsel %vm2066_vm2, %v3316_v33, 0.0 }
  0xf7   : > { %1943 = vst.msk [vmem:[%s3708_s28 + $0x14] sm:$0xf] %vm1937_vm1, %v3116_v39  ;;  %v2468_v47 = vsel %vm2066_vm2, %v2336_v43, 0.0  ;;  %v2472_v60 = vsel %vm2066_vm2, %v2338_v46, 0.0  ;;  %v3771_v43 = vpop.f32.mrb[0].mxu1 }
  0xf8   : > { %v2079_v48 = vadd.f32 %v2078_v45, %v2077_v44  ;;  %v2469_v49 = vadd.f32 %v2468_v47, %v2467_v41 }
  0xf9   : > { %v3319_v50 = vpop.f32.mrb[8].mxu0 }
  0xfa   : > { %v3121_v53 = vpack.c.bf16 %v3319_v50, %v3319_v50  ;;  %v946_v54 = vpop.f32.mrb[9].mxu0  ;;  %v2471_v55 = vadd.f32 %v2470_v51, %v2469_v49  ;;  %v2081_v57 = vadd.f32 %v2080_v52, %v2079_v48  ;;  %v2341_v3 = vmul.f32 %v3319_v50, %v3319_v50  ;;  %v3777_v49 = vpop.f32.mrb[1].mxu1 }
  0xfb   : > { %v3119_v56 = vpack.c.bf16 %v946_v54, %v946_v54  ;;  %v2082_v58 = vsel %vm2066_vm2, %v946_v54, 0.0  ;;  %v3320_v59 = vpop.f32.mrb[10].mxu0  ;;  %v2339_v61 = vmul.f32 %v946_v54, %v946_v54  ;;  %v2086_v9 = vsel %vm2066_vm2, %v3319_v50, 0.0 }
  0xfc   : > { %1948 = vst.msk [vmem:[%s3708_s28 + $0x28] sm:$0xf] %vm1937_vm1, %v3121_v53  ;;  %v3122_v62 = vpack.c.bf16 %v3320_v59, %v3320_v59  ;;  %v949_v63 = vpop.f32.mrb[11].mxu0  ;;  %v2083_v0 = vadd.f32 %v2082_v58, %v2081_v57  ;;  %v2473_v1 = vadd.f32 %v2472_v60, %v2471_v55  ;;  %v2342_v10 = vmul.f32 %v3320_v59, %v3320_v59  ;;  %v3780_v55 = vpop.f32.mrb[2].mxu1 }
  0xfd   : > { %1946 = vst.msk [vmem:[%s3708_s28 + $0x20] sm:$0xf] %vm1937_vm1, %v3119_v56  ;;  %v3120_v2 = vpack.c.bf16 %v949_v63, %v949_v63  ;;  %v2474_v4 = vsel %vm2066_vm2, %v2339_v61, 0.0  ;;  %v2084_v5 = vsel %vm2066_vm2, %v949_v63, 0.0  ;;  %v2340_v6 = vmul.f32 %v949_v63, %v949_v63  ;;  %v3787_v60 = vpop.f32.mrb[3].mxu1 }
  0xfe   : > { %1949 = vst.msk [vmem:[%s3708_s28 + $0x2c] sm:$0xf] %vm1937_vm1, %v3122_v62  ;;  %v2475_v7 = vadd.f32 %v2474_v4, %v2473_v1  ;;  %v2085_v8 = vadd.f32 %v2084_v5, %v2083_v0  ;;  %v2478_v15 = vsel %vm2066_vm2, %v2341_v3, 0.0  ;;  %v2088_v16 = vsel %vm2066_vm2, %v3320_v59, 0.0 }
  0xff   : > { %1947 = vst.msk [vmem:[%s3708_s28 + $0x24] sm:$0xf] %vm1937_vm1, %v3120_v2  ;;  %v2476_v11 = vsel %vm2066_vm2, %v2340_v6, 0.0  ;;  %v2480_v24 = vsel %vm2066_vm2, %v2342_v10, 0.0  ;;  %v3177_v48 = vpack.c.bf16 %v3771_v43, %v3771_v43 }
 0x100   : > { %v2087_v12 = vadd.f32 %v2086_v9, %v2085_v8  ;;  %v2477_v13 = vadd.f32 %v2476_v11, %v2475_v7  ;;  %v3175_v9 = vpack.c.bf16 %v3777_v49, %v3777_v49 }
 0x101   : > { %v3323_v14 = vpop.f32.mrb[12].mxu0  ;;  %2004 = vst.msk [vmem:[%s3708_s28 + $0x108] sm:$0xf] %vm1937_vm1, %v3177_v48 }
 0x102   : > { %v3125_v17 = vpack.c.bf16 %v3323_v14, %v3323_v14  ;;  %v962_v18 = vpop.f32.mrb[13].mxu0  ;;  %v2479_v19 = vadd.f32 %v2478_v15, %v2477_v13  ;;  %v2089_v21 = vadd.f32 %v2088_v16, %v2087_v12  ;;  %v2345_v31 = vmul.f32 %v3323_v14, %v3323_v14  ;;  %2002 = vst.msk [vmem:[%s3708_s28 + $0x100] sm:$0xf] %vm1937_vm1, %v3175_v9 }
 0x103   : > { %v3123_v20 = vpack.c.bf16 %v962_v18, %v962_v18  ;;  %v2090_v22 = vsel %vm2066_vm2, %v962_v18, 0.0  ;;  %v3324_v23 = vpop.f32.mrb[14].mxu0  ;;  %v2343_v25 = vmul.f32 %v962_v18, %v962_v18  ;;  %v2094_v37 = vsel %vm2066_vm2, %v3323_v14, 0.0  ;;  %v3803_v14 = vpop.f32.mrb[4].mxu1 }
 0x104   : > { %1952 = vst.msk [vmem:[%s3708_s28 + $0x38] sm:$0xf] %vm1937_vm1, %v3125_v17  ;;  %v3126_v26 = vpack.c.bf16 %v3324_v23, %v3324_v23  ;;  %v965_v27 = vpop.f32.mrb[15].mxu0  ;;  %v2091_v28 = vadd.f32 %v2090_v22, %v2089_v21  ;;  %v2481_v29 = vadd.f32 %v2480_v24, %v2479_v19  ;;  %v2346_v38 = vmul.f32 %v3324_v23, %v3324_v23  ;;  %v3809_v19 = vpop.f32.mrb[5].mxu1 }
 0x105   : > { %1950 = vst.msk [vmem:[%s3708_s28 + $0x30] sm:$0xf] %vm1937_vm1, %v3123_v20  ;;  %v3124_v30 = vpack.c.bf16 %v965_v27, %v965_v27  ;;  %v2482_v32 = vsel %vm2066_vm2, %v2343_v25, 0.0  ;;  %v2092_v33 = vsel %vm2066_vm2, %v965_v27, 0.0  ;;  %v2344_v34 = vmul.f32 %v965_v27, %v965_v27  ;;  %v3814_v25 = vpop.f32.mrb[6].mxu1 }
 0x106   : > { %1953 = vst.msk [vmem:[%s3708_s28 + $0x3c] sm:$0xf] %vm1937_vm1, %v3126_v26  ;;  %v2483_v35 = vadd.f32 %v2482_v32, %v2481_v29  ;;  %v2093_v36 = vadd.f32 %v2092_v33, %v2091_v28  ;;  %v2486_v44 = vsel %vm2066_vm2, %v2345_v31, 0.0  ;;  %v2096_v45 = vsel %vm2066_vm2, %v3324_v23, 0.0 }
 0x107   : > { %1951 = vst.msk [vmem:[%s3708_s28 + $0x34] sm:$0xf] %vm1937_vm1, %v3124_v30  ;;  %v2484_v39 = vsel %vm2066_vm2, %v2344_v34, 0.0  ;;  %v2488_v56 = vsel %vm2066_vm2, %v2346_v38, 0.0  ;;  %v3178_v13 = vpack.c.bf16 %v3780_v55, %v3780_v55  ;;  %v3819_v30 = vpop.f32.mrb[7].mxu1  ;;  %v3181_v48 = vpack.c.bf16 %v3803_v14, %v3803_v14 }
 0x108   : > { %v2095_v40 = vadd.f32 %v2094_v37, %v2093_v36  ;;  %v2485_v41 = vadd.f32 %v2484_v39, %v2483_v35 }
 0x109   : > { %v3327_v42 = vpop.f32.mrb[16].mxu0  ;;  %2005 = vst.msk [vmem:[%s3708_s28 + $0x10c] sm:$0xf] %vm1937_vm1, %v3178_v13  ;;  %2008 = vst.msk [vmem:[%s3708_s28 + $0x118] sm:$0xf] %vm1937_vm1, %v3181_v48 }
 0x10a   : > { %v3129_v46 = vpack.c.bf16 %v3327_v42, %v3327_v42  ;;  %v978_v47 = vpop.f32.mrb[17].mxu0  ;;  %v2487_v50 = vadd.f32 %v2486_v44, %v2485_v41  ;;  %v2097_v52 = vadd.f32 %v2096_v45, %v2095_v40  ;;  %v2349_v0 = vmul.f32 %v3327_v42, %v3327_v42 }
 0x10b   : > { %v3127_v51 = vpack.c.bf16 %v978_v47, %v978_v47  ;;  %v2098_v53 = vsel %vm2066_vm2, %v978_v47, 0.0  ;;  %v3328_v54 = vpop.f32.mrb[18].mxu0  ;;  %v2347_v57 = vmul.f32 %v978_v47, %v978_v47  ;;  %v2102_v6 = vsel %vm2066_vm2, %v3327_v42, 0.0 }
 0x10c   : > { %1956 = vst.msk [vmem:[%s3708_s28 + $0x48] sm:$0xf] %vm1937_vm1, %v3129_v46  ;;  %v3130_v58 = vpack.c.bf16 %v3328_v54, %v3328_v54  ;;  %v981_v59 = vpop.f32.mrb[19].mxu0  ;;  %v2099_v61 = vadd.f32 %v2098_v53, %v2097_v52  ;;  %v2489_v62 = vadd.f32 %v2488_v56, %v2487_v50  ;;  %v2350_v7 = vmul.f32 %v3328_v54, %v3328_v54  ;;  %v3835_v50 = vpop.f32.mrb[8].mxu1 }
 0x10d   : > { %1954 = vst.msk [vmem:[%s3708_s28 + $0x40] sm:$0xf] %vm1937_vm1, %v3127_v51  ;;  %v3128_v63 = vpack.c.bf16 %v981_v59, %v981_v59  ;;  %v2490_v1 = vsel %vm2066_vm2, %v2347_v57, 0.0  ;;  %v2100_v2 = vsel %vm2066_vm2, %v981_v59, 0.0  ;;  %v2348_v3 = vmul.f32 %v981_v59, %v981_v59  ;;  %v3841_v56 = vpop.f32.mrb[9].mxu1 }
 0x10e   : > { %1957 = vst.msk [vmem:[%s3708_s28 + $0x4c] sm:$0xf] %vm1937_vm1, %v3130_v58  ;;  %v2491_v4 = vadd.f32 %v2490_v1, %v2489_v62  ;;  %v2101_v5 = vadd.f32 %v2100_v2, %v2099_v61  ;;  %v2494_v15 = vsel %vm2066_vm2, %v2349_v0, 0.0  ;;  %v2104_v16 = vsel %vm2066_vm2, %v3328_v54, 0.0 }
 0x10f   : > { %1955 = vst.msk [vmem:[%s3708_s28 + $0x44] sm:$0xf] %vm1937_vm1, %v3128_v63  ;;  %v2492_v8 = vsel %vm2066_vm2, %v2348_v3, 0.0  ;;  %v2496_v26 = vsel %vm2066_vm2, %v2350_v7, 0.0  ;;  %v3176_v44 = vpack.c.bf16 %v3787_v60, %v3787_v60  ;;  %v3846_v63 = vpop.f32.mrb[10].mxu1 }
 0x110   : > { %v2103_v10 = vadd.f32 %v2102_v6, %v2101_v5  ;;  %v2493_v11 = vadd.f32 %v2492_v8, %v2491_v4  ;;  %v3851_v4 = vpop.f32.mrb[11].mxu1 }
 0x111   : > { %v3331_v12 = vpop.f32.mrb[20].mxu0  ;;  %2003 = vst.msk [vmem:[%s3708_s28 + $0x104] sm:$0xf] %vm1937_vm1, %v3176_v44 }
 0x112   : > { %v3133_v17 = vpack.c.bf16 %v3331_v12, %v3331_v12  ;;  %v994_v18 = vpop.f32.mrb[21].mxu0  ;;  %v2495_v20 = vadd.f32 %v2494_v15, %v2493_v11  ;;  %v2105_v22 = vadd.f32 %v2104_v16, %v2103_v10  ;;  %v2353_v34 = vmul.f32 %v3331_v12, %v3331_v12 }
 0x113   : > { %v3131_v21 = vpack.c.bf16 %v994_v18, %v994_v18  ;;  %v2106_v23 = vsel %vm2066_vm2, %v994_v18, 0.0  ;;  %v3332_v24 = vpop.f32.mrb[22].mxu0  ;;  %v2351_v27 = vmul.f32 %v994_v18, %v994_v18  ;;  %v2110_v40 = vsel %vm2066_vm2, %v3331_v12, 0.0 }
 0x114   : > { %1960 = vst.msk [vmem:[%s3708_s28 + $0x58] sm:$0xf] %vm1937_vm1, %v3133_v17  ;;  %v3134_v28 = vpack.c.bf16 %v3332_v24, %v3332_v24  ;;  %v997_v29 = vpop.f32.mrb[23].mxu0  ;;  %v2107_v31 = vadd.f32 %v2106_v23, %v2105_v22  ;;  %v2497_v32 = vadd.f32 %v2496_v26, %v2495_v20  ;;  %v2354_v41 = vmul.f32 %v3332_v24, %v3332_v24 }
 0x115   : > { %1958 = vst.msk [vmem:[%s3708_s28 + $0x50] sm:$0xf] %vm1937_vm1, %v3131_v21  ;;  %v3132_v33 = vpack.c.bf16 %v997_v29, %v997_v29  ;;  %v2498_v35 = vsel %vm2066_vm2, %v2351_v27, 0.0  ;;  %v2108_v36 = vsel %vm2066_vm2, %v997_v29, 0.0  ;;  %v2352_v37 = vmul.f32 %v997_v29, %v997_v29 }
 0x116   : > { %1961 = vst.msk [vmem:[%s3708_s28 + $0x5c] sm:$0xf] %vm1937_vm1, %v3134_v28  ;;  %v2499_v38 = vadd.f32 %v2498_v35, %v2497_v32  ;;  %v2109_v39 = vadd.f32 %v2108_v36, %v2107_v31  ;;  %v2502_v51 = vsel %vm2066_vm2, %v2353_v34, 0.0  ;;  %v2112_v52 = vsel %vm2066_vm2, %v3332_v24, 0.0  ;;  %v3867_v24 = vpop.f32.mrb[12].mxu1 }
 0x117   : > { %1959 = vst.msk [vmem:[%s3708_s28 + $0x54] sm:$0xf] %vm1937_vm1, %v3132_v33  ;;  %v2500_v42 = vsel %vm2066_vm2, %v2352_v37, 0.0  ;;  %v2504_v0 = vsel %vm2066_vm2, %v2354_v41, 0.0  ;;  %v3179_v18 = vpack.c.bf16 %v3809_v19, %v3809_v19  ;;  %v3182_v23 = vpack.c.bf16 %v3814_v25, %v3814_v25  ;;  %v3873_v31 = vpop.f32.mrb[13].mxu1 }
 0x118   : > { %v2111_v45 = vadd.f32 %v2110_v40, %v2109_v39  ;;  %v2501_v46 = vadd.f32 %v2500_v42, %v2499_v38  ;;  %v3878_v37 = vpop.f32.mrb[14].mxu1 }
 0x119   : > { %v3335_v47 = vpop.f32.mrb[24].mxu0  ;;  %2006 = vst.msk [vmem:[%s3708_s28 + $0x110] sm:$0xf] %vm1937_vm1, %v3179_v18  ;;  %2009 = vst.msk [vmem:[%s3708_s28 + $0x11c] sm:$0xf] %vm1937_vm1, %v3182_v23  ;;  %v3883_v42 = vpop.f32.mrb[15].mxu1 }
 0x11a   : > { %v3137_v53 = vpack.c.bf16 %v3335_v47, %v3335_v47  ;;  %v1010_v54 = vpop.f32.mrb[25].mxu0  ;;  %v2503_v57 = vadd.f32 %v2502_v51, %v2501_v46  ;;  %v2113_v59 = vadd.f32 %v2112_v52, %v2111_v45  ;;  %v2357_v8 = vmul.f32 %v3335_v47, %v3335_v47 }
 0x11b   : > { %v3135_v58 = vpack.c.bf16 %v1010_v54, %v1010_v54  ;;  %v2114_v61 = vsel %vm2066_vm2, %v1010_v54, 0.0  ;;  %v3336_v62 = vpop.f32.mrb[26].mxu0  ;;  %v2355_v1 = vmul.f32 %v1010_v54, %v1010_v54  ;;  %v2118_v15 = vsel %vm2066_vm2, %v3335_v47, 0.0 }
 0x11c   : > { %1964 = vst.msk [vmem:[%s3708_s28 + $0x68] sm:$0xf] %vm1937_vm1, %v3137_v53  ;;  %v3138_v2 = vpack.c.bf16 %v3336_v62, %v3336_v62  ;;  %v1013_v3 = vpop.f32.mrb[27].mxu0  ;;  %v2115_v5 = vadd.f32 %v2114_v61, %v2113_v59  ;;  %v2505_v6 = vadd.f32 %v2504_v0, %v2503_v57  ;;  %v2358_v16 = vmul.f32 %v3336_v62, %v3336_v62 }
 0x11d   : > { %1962 = vst.msk [vmem:[%s3708_s28 + $0x60] sm:$0xf] %vm1937_vm1, %v3135_v58  ;;  %v3136_v7 = vpack.c.bf16 %v1013_v3, %v1013_v3  ;;  %v2506_v9 = vsel %vm2066_vm2, %v2355_v1, 0.0  ;;  %v2116_v10 = vsel %vm2066_vm2, %v1013_v3, 0.0  ;;  %v2356_v11 = vmul.f32 %v1013_v3, %v1013_v3  ;;  %v3899_v3 = vpop.f32.mrb[16].mxu1 }
 0x11e   : > { %1965 = vst.msk [vmem:[%s3708_s28 + $0x6c] sm:$0xf] %vm1937_vm1, %v3138_v2  ;;  %v2507_v12 = vadd.f32 %v2506_v9, %v2505_v6  ;;  %v2117_v13 = vadd.f32 %v2116_v10, %v2115_v5  ;;  %v2510_v26 = vsel %vm2066_vm2, %v2357_v8, 0.0  ;;  %v2120_v27 = vsel %vm2066_vm2, %v3336_v62, 0.0  ;;  %v3905_v9 = vpop.f32.mrb[17].mxu1 }
 0x11f   : > { %1963 = vst.msk [vmem:[%s3708_s28 + $0x64] sm:$0xf] %vm1937_vm1, %v3136_v7  ;;  %v2508_v17 = vsel %vm2066_vm2, %v2356_v11, 0.0  ;;  %v2512_v38 = vsel %vm2066_vm2, %v2358_v16, 0.0  ;;  %v3180_v61 = vpack.c.bf16 %v3819_v30, %v3819_v30  ;;  %v3185_v2 = vpack.c.bf16 %v3835_v50, %v3835_v50  ;;  %v3910_v16 = vpop.f32.mrb[18].mxu1 }
 0x120   : > { %v2119_v20 = vadd.f32 %v2118_v15, %v2117_v13  ;;  %v2509_v21 = vadd.f32 %v2508_v17, %v2507_v12  ;;  %4696 = vst [vmem:[#allocation2_spill] sm:$0xff] %v3910_v16 }
 0x121   : > { %v3339_v22 = vpop.f32.mrb[28].mxu0  ;;  %2007 = vst.msk [vmem:[%s3708_s28 + $0x114] sm:$0xf] %vm1937_vm1, %v3180_v61  ;;  %2012 = vst.msk [vmem:[%s3708_s28 + $0x128] sm:$0xf] %vm1937_vm1, %v3185_v2 }
 0x122   : > { %v3141_v28 = vpack.c.bf16 %v3339_v22, %v3339_v22  ;;  %v1026_v29 = vpop.f32.mrb[29].mxu0  ;;  %v2511_v32 = vadd.f32 %v2510_v26, %v2509_v21  ;;  %v2121_v34 = vadd.f32 %v2120_v27, %v2119_v20  ;;  %v2361_v47 = vmul.f32 %v3339_v22, %v3339_v22 }
 0x123   : > { %v3139_v33 = vpack.c.bf16 %v1026_v29, %v1026_v29  ;;  %v2122_v35 = vsel %vm2066_vm2, %v1026_v29, 0.0  ;;  %v3340_v36 = vpop.f32.mrb[30].mxu0  ;;  %v2359_v39 = vmul.f32 %v1026_v29, %v1026_v29  ;;  %v2126_v57 = vsel %vm2066_vm2, %v3339_v22, 0.0  ;;  %v3915_v22 = vpop.f32.mrb[19].mxu1 }
 0x124   : > { %1968 = vst.msk [vmem:[%s3708_s28 + $0x78] sm:$0xf] %vm1937_vm1, %v3141_v28  ;;  %v3142_v40 = vpack.c.bf16 %v3340_v36, %v3340_v36  ;;  %v1029_v41 = vpop.f32.mrb[31].mxu0  ;;  %v2123_v44 = vadd.f32 %v2122_v35, %v2121_v34  ;;  %v2513_v45 = vadd.f32 %v2512_v38, %v2511_v32  ;;  %v2362_v58 = vmul.f32 %v3340_v36, %v3340_v36 }
 0x125   : > { %1966 = vst.msk [vmem:[%s3708_s28 + $0x70] sm:$0xf] %vm1937_vm1, %v3139_v33  ;;  %v3140_v46 = vpack.c.bf16 %v1029_v41, %v1029_v41  ;;  %v2514_v48 = vsel %vm2066_vm2, %v2359_v39, 0.0  ;;  %v2124_v51 = vsel %vm2066_vm2, %v1029_v41, 0.0  ;;  %v2360_v52 = vmul.f32 %v1029_v41, %v1029_v41 }
 0x126   : > { %1969 = vst.msk [vmem:[%s3708_s28 + $0x7c] sm:$0xf] %vm1937_vm1, %v3142_v40  ;;  %v2515_v53 = vadd.f32 %v2514_v48, %v2513_v45  ;;  %v2125_v54 = vadd.f32 %v2124_v51, %v2123_v44  ;;  %v2518_v5 = vsel %vm2066_vm2, %v2361_v47, 0.0  ;;  %v2128_v6 = vsel %vm2066_vm2, %v3340_v36, 0.0  ;;  %v3931_v47 = vpop.f32.mrb[20].mxu1 }
 0x127   : > { %1967 = vst.msk [vmem:[%s3708_s28 + $0x74] sm:$0xf] %vm1937_vm1, %v3140_v46  ;;  %v2516_v59 = vsel %vm2066_vm2, %v2360_v52, 0.0  ;;  %v2520_v17 = vsel %vm2066_vm2, %v2362_v58, 0.0  ;;  %v3183_v40 = vpack.c.bf16 %v3841_v56, %v3841_v56  ;;  %v3186_v46 = vpack.c.bf16 %v3846_v63, %v3846_v63  ;;  %4697 = vst [vmem:[#allocation3_spill] sm:$0xff] %v3931_v47 }
 0x128   : > { %v2127_v62 = vadd.f32 %v2126_v57, %v2125_v54  ;;  %v2517_v0 = vadd.f32 %v2516_v59, %v2515_v53  ;;  %v3937_v54 = vpop.f32.mrb[21].mxu1 }
 0x129   : > { %v3343_v1 = vpop.f32.mrb[32].mxu0  ;;  %2010 = vst.msk [vmem:[%s3708_s28 + $0x120] sm:$0xf] %vm1937_vm1, %v3183_v40  ;;  %4698 = vst [vmem:[#allocation4_spill] sm:$0xff] %v3937_v54 }
 0x12a   : > { %v3145_v7 = vpack.c.bf16 %v3343_v1, %v3343_v1  ;;  %v1042_v8 = vpop.f32.mrb[33].mxu0  ;;  %v2519_v10 = vadd.f32 %v2518_v5, %v2517_v0  ;;  %v2129_v12 = vadd.f32 %v2128_v6, %v2127_v62  ;;  %v2365_v28 = vmul.f32 %v3343_v1, %v3343_v1  ;;  %2013 = vst.msk [vmem:[%s3708_s28 + $0x12c] sm:$0xf] %vm1937_vm1, %v3186_v46  ;;  %v3942_v0 = vpop.f32.mrb[22].mxu1 }
 0x12b   : > { %v3143_v11 = vpack.c.bf16 %v1042_v8, %v1042_v8  ;;  %v2130_v13 = vsel %vm2066_vm2, %v1042_v8, 0.0  ;;  %v3344_v15 = vpop.f32.mrb[34].mxu0  ;;  %v2363_v18 = vmul.f32 %v1042_v8, %v1042_v8  ;;  %v2134_v36 = vsel %vm2066_vm2, %v3343_v1, 0.0  ;;  %4699 = vst [vmem:[#allocation5_spill] sm:$0xff] %v3942_v0 }
 0x12c   : > { %1972 = vst.msk [vmem:[%s3708_s28 + $0x88] sm:$0xf] %vm1937_vm1, %v3145_v7  ;;  %v3146_v20 = vpack.c.bf16 %v3344_v15, %v3344_v15  ;;  %v1045_v21 = vpop.f32.mrb[35].mxu0  ;;  %v2131_v23 = vadd.f32 %v2130_v13, %v2129_v12  ;;  %v2521_v26 = vadd.f32 %v2520_v17, %v2519_v10  ;;  %v2366_v38 = vmul.f32 %v3344_v15, %v3344_v15  ;;  %v3947_v7 = vpop.f32.mrb[23].mxu1 }
 0x12d   : > { %1970 = vst.msk [vmem:[%s3708_s28 + $0x80] sm:$0xf] %vm1937_vm1, %v3143_v11  ;;  %v3144_v27 = vpack.c.bf16 %v1045_v21, %v1045_v21  ;;  %v2522_v29 = vsel %vm2066_vm2, %v2363_v18, 0.0  ;;  %v2132_v32 = vsel %vm2066_vm2, %v1045_v21, 0.0  ;;  %v2364_v33 = vmul.f32 %v1045_v21, %v1045_v21 }
 0x12e   : > { %1973 = vst.msk [vmem:[%s3708_s28 + $0x8c] sm:$0xf] %vm1937_vm1, %v3146_v20  ;;  %v2523_v34 = vadd.f32 %v2522_v29, %v2521_v26  ;;  %v2133_v35 = vadd.f32 %v2132_v32, %v2131_v23  ;;  %v2526_v48 = vsel %vm2066_vm2, %v2365_v28, 0.0  ;;  %v2136_v51 = vsel %vm2066_vm2, %v3344_v15, 0.0 }
 0x12f   : > { %1971 = vst.msk [vmem:[%s3708_s28 + $0x84] sm:$0xf] %vm1937_vm1, %v3144_v27  ;;  %v2524_v39 = vsel %vm2066_vm2, %v2364_v33, 0.0  ;;  %v2528_v1 = vsel %vm2066_vm2, %v2366_v38, 0.0  ;;  %v3184_v27 = vpack.c.bf16 %v3851_v4, %v3851_v4  ;;  %v3189_v33 = vpack.c.bf16 %v3867_v24, %v3867_v24 }
 0x130   : > { %v2135_v41 = vadd.f32 %v2134_v36, %v2133_v35  ;;  %v2525_v44 = vadd.f32 %v2524_v39, %v2523_v34  ;;  %v3963_v34 = vpop.f32.mrb[24].mxu1 }
 0x131   : > { %v3347_v45 = vpop.f32.mrb[36].mxu0  ;;  %2011 = vst.msk [vmem:[%s3708_s28 + $0x124] sm:$0xf] %vm1937_vm1, %v3184_v27  ;;  %v3969_v40 = vpop.f32.mrb[25].mxu1  ;;  %2016 = vst.msk [vmem:[%s3708_s28 + $0x138] sm:$0xf] %vm1937_vm1, %v3189_v33 }
 0x132   : > { %v3149_v52 = vpack.c.bf16 %v3347_v45, %v3347_v45  ;;  %v1058_v53 = vpop.f32.mrb[37].mxu0  ;;  %v2527_v57 = vadd.f32 %v2526_v48, %v2525_v44  ;;  %v2137_v59 = vadd.f32 %v2136_v51, %v2135_v41  ;;  %v2369_v12 = vmul.f32 %v3347_v45, %v3347_v45  ;;  %v3974_v51 = vpop.f32.mrb[26].mxu1 }
 0x133   : > { %v3147_v58 = vpack.c.bf16 %v1058_v53, %v1058_v53  ;;  %v2138_v61 = vsel %vm2066_vm2, %v1058_v53, 0.0  ;;  %v3348_v62 = vpop.f32.mrb[38].mxu0  ;;  %v2367_v2 = vmul.f32 %v1058_v53, %v1058_v53  ;;  %v2142_v21 = vsel %vm2066_vm2, %v3347_v45, 0.0 }
 0x134   : > { %1976 = vst.msk [vmem:[%s3708_s28 + $0x98] sm:$0xf] %vm1937_vm1, %v3149_v52  ;;  %v3150_v5 = vpack.c.bf16 %v3348_v62, %v3348_v62  ;;  %v1061_v6 = vpop.f32.mrb[39].mxu0  ;;  %v2139_v8 = vadd.f32 %v2138_v61, %v2137_v59  ;;  %v2529_v10 = vadd.f32 %v2528_v1, %v2527_v57  ;;  %v2370_v23 = vmul.f32 %v3348_v62, %v3348_v62  ;;  %v3979_v59 = vpop.f32.mrb[27].mxu1 }
 0x135   : > { %1974 = vst.msk [vmem:[%s3708_s28 + $0x90] sm:$0xf] %vm1937_vm1, %v3147_v58  ;;  %v3148_v11 = vpack.c.bf16 %v1061_v6, %v1061_v6  ;;  %v2530_v13 = vsel %vm2066_vm2, %v2367_v2, 0.0  ;;  %v2140_v15 = vsel %vm2066_vm2, %v1061_v6, 0.0  ;;  %v2368_v17 = vmul.f32 %v1061_v6, %v1061_v6 }
 0x136   : > { %1977 = vst.msk [vmem:[%s3708_s28 + $0x9c] sm:$0xf] %vm1937_vm1, %v3150_v5  ;;  %v2531_v18 = vadd.f32 %v2530_v13, %v2529_v10  ;;  %v2141_v20 = vadd.f32 %v2140_v15, %v2139_v8  ;;  %v2534_v35 = vsel %vm2066_vm2, %v2369_v12, 0.0  ;;  %v2144_v36 = vsel %vm2066_vm2, %v3348_v62, 0.0 }
 0x137   : > { %1975 = vst.msk [vmem:[%s3708_s28 + $0x94] sm:$0xf] %vm1937_vm1, %v3148_v11  ;;  %v2532_v26 = vsel %vm2066_vm2, %v2368_v17, 0.0  ;;  %v2536_v52 = vsel %vm2066_vm2, %v2370_v23, 0.0  ;;  %v3187_v17 = vpack.c.bf16 %v3873_v31, %v3873_v31  ;;  %v3190_v23 = vpack.c.bf16 %v3878_v37, %v3878_v37 }
 0x138   : > { %v2143_v28 = vadd.f32 %v2142_v21, %v2141_v20  ;;  %v2533_v29 = vadd.f32 %v2532_v26, %v2531_v18  ;;  %v3995_v26 = vpop.f32.mrb[28].mxu1 }
 0x139   : > { %v3351_v32 = vpop.f32.mrb[40].mxu0  ;;  %2014 = vst.msk [vmem:[%s3708_s28 + $0x130] sm:$0xf] %vm1937_vm1, %v3187_v17  ;;  %v4001_v33 = vpop.f32.mrb[29].mxu1  ;;  %2017 = vst.msk [vmem:[%s3708_s28 + $0x13c] sm:$0xf] %vm1937_vm1, %v3190_v23 }
 0x13a   : > { %v3153_v38 = vpack.c.bf16 %v3351_v32, %v3351_v32  ;;  %v1074_v39 = vpop.f32.mrb[41].mxu0  ;;  %v2535_v41 = vadd.f32 %v2534_v35, %v2533_v29  ;;  %v2145_v45 = vadd.f32 %v2144_v36, %v2143_v28  ;;  %v2373_v2 = vmul.f32 %v3351_v32, %v3351_v32 }
 0x13b   : > { %v3151_v44 = vpack.c.bf16 %v1074_v39, %v1074_v39  ;;  %v2146_v46 = vsel %vm2066_vm2, %v1074_v39, 0.0  ;;  %v3352_v48 = vpop.f32.mrb[42].mxu0  ;;  %v2371_v53 = vmul.f32 %v1074_v39, %v1074_v39  ;;  %v2150_v12 = vsel %vm2066_vm2, %v3351_v32, 0.0 }
 0x13c   : > { %1980 = vst.msk [vmem:[%s3708_s28 + $0xa8] sm:$0xf] %vm1937_vm1, %v3153_v38  ;;  %v3154_v57 = vpack.c.bf16 %v3352_v48, %v3352_v48  ;;  %v1077_v58 = vpop.f32.mrb[43].mxu0  ;;  %v2147_v61 = vadd.f32 %v2146_v46, %v2145_v45  ;;  %v2537_v62 = vadd.f32 %v2536_v52, %v2535_v41  ;;  %v2374_v13 = vmul.f32 %v3352_v48, %v3352_v48 }
 0x13d   : > { %1978 = vst.msk [vmem:[%s3708_s28 + $0xa0] sm:$0xf] %vm1937_vm1, %v3151_v44  ;;  %v3152_v1 = vpack.c.bf16 %v1077_v58, %v1077_v58  ;;  %v2538_v5 = vsel %vm2066_vm2, %v2371_v53, 0.0  ;;  %v2148_v6 = vsel %vm2066_vm2, %v1077_v58, 0.0  ;;  %v2372_v8 = vmul.f32 %v1077_v58, %v1077_v58  ;;  %v4006_v44 = vpop.f32.mrb[30].mxu1 }
 0x13e   : > { %1981 = vst.msk [vmem:[%s3708_s28 + $0xac] sm:$0xf] %vm1937_vm1, %v3154_v57  ;;  %v2539_v10 = vadd.f32 %v2538_v5, %v2537_v62  ;;  %v2149_v11 = vadd.f32 %v2148_v6, %v2147_v61  ;;  %v2542_v27 = vsel %vm2066_vm2, %v2373_v2, 0.0  ;;  %v2152_v28 = vsel %vm2066_vm2, %v3352_v48, 0.0  ;;  %v4011_v53 = vpop.f32.mrb[31].mxu1 }
 0x13f   : > { %1979 = vst.msk [vmem:[%s3708_s28 + $0xa4] sm:$0xf] %vm1937_vm1, %v3152_v1  ;;  %v2540_v15 = vsel %vm2066_vm2, %v2372_v8, 0.0  ;;  %v2544_v45 = vsel %vm2066_vm2, %v2374_v13, 0.0  ;;  %v3188_v13 = vpack.c.bf16 %v3883_v42, %v3883_v42  ;;  %v4027_v23 = vpop.f32.mrb[32].mxu1 }
 0x140   : > { %v2151_v18 = vadd.f32 %v2150_v12, %v2149_v11  ;;  %v2541_v20 = vadd.f32 %v2540_v15, %v2539_v10 }
 0x141   : > { %v3355_v21 = vpop.f32.mrb[44].mxu0  ;;  %2015 = vst.msk [vmem:[%s3708_s28 + $0x134] sm:$0xf] %vm1937_vm1, %v3188_v13 }
 0x142   : > { %v3157_v29 = vpack.c.bf16 %v3355_v21, %v3355_v21  ;;  %v1090_v32 = vpop.f32.mrb[45].mxu0  ;;  %v2543_v35 = vadd.f32 %v2542_v27, %v2541_v20  ;;  %v2153_v38 = vadd.f32 %v2152_v28, %v2151_v18  ;;  %v2377_v62 = vmul.f32 %v3355_v21, %v3355_v21 }
 0x143   : > { %v3155_v36 = vpack.c.bf16 %v1090_v32, %v1090_v32  ;;  %v2154_v39 = vsel %vm2066_vm2, %v1090_v32, 0.0  ;;  %v3356_v41 = vpop.f32.mrb[46].mxu0  ;;  %v2375_v46 = vmul.f32 %v1090_v32, %v1090_v32  ;;  %v2158_v10 = vsel %vm2066_vm2, %v3355_v21, 0.0  ;;  %v4033_v32 = vpop.f32.mrb[33].mxu1 }
 0x144   : > { %1984 = vst.msk [vmem:[%s3708_s28 + $0xb8] sm:$0xf] %vm1937_vm1, %v3157_v29  ;;  %v3158_v48 = vpack.c.bf16 %v3356_v41, %v3356_v41  ;;  %v1093_v52 = vpop.f32.mrb[47].mxu0  ;;  %v2155_v57 = vadd.f32 %v2154_v39, %v2153_v38  ;;  %v2545_v58 = vadd.f32 %v2544_v45, %v2543_v35  ;;  %v2378_v11 = vmul.f32 %v3356_v41, %v3356_v41 }
 0x145   : > { %1982 = vst.msk [vmem:[%s3708_s28 + $0xb0] sm:$0xf] %vm1937_vm1, %v3155_v36  ;;  %v3156_v61 = vpack.c.bf16 %v1093_v52, %v1093_v52  ;;  %v2546_v1 = vsel %vm2066_vm2, %v2375_v46, 0.0  ;;  %v2156_v2 = vsel %vm2066_vm2, %v1093_v52, 0.0  ;;  %v2376_v5 = vmul.f32 %v1093_v52, %v1093_v52  ;;  %v4038_v46 = vpop.f32.mrb[34].mxu1 }
 0x146   : > { %1985 = vst.msk [vmem:[%s3708_s28 + $0xbc] sm:$0xf] %vm1937_vm1, %v3158_v48  ;;  %v2547_v6 = vadd.f32 %v2546_v1, %v2545_v58  ;;  %v2157_v8 = vadd.f32 %v2156_v2, %v2155_v57  ;;  %v3193_v20 = vpack.c.bf16 %v3899_v3, %v3899_v3  ;;  %v2550_v27 = vsel %vm2066_vm2, %v2377_v62, 0.0  ;;  %v4043_v58 = vpop.f32.mrb[35].mxu1 }
 0x147   : > { %1983 = vst.msk [vmem:[%s3708_s28 + $0xb4] sm:$0xf] %vm1937_vm1, %v3156_v61  ;;  %v2548_v12 = vsel %vm2066_vm2, %v2376_v5, 0.0  ;;  %v2160_v21 = vsel %vm2066_vm2, %v3356_v41, 0.0  ;;  %v2552_v41 = vsel %vm2066_vm2, %v2378_v11, 0.0 }
 0x148   : > { %v2159_v15 = vadd.f32 %v2158_v10, %v2157_v8  ;;  %v2549_v17 = vadd.f32 %v2548_v12, %v2547_v6  ;;  %2020 = vst.msk [vmem:[%s3708_s28 + $0x148] sm:$0xf] %vm1937_vm1, %v3193_v20 }
 0x149   : > { %v3359_v18 = vpop.f32.mrb[48].mxu0 }
 0x14a   : > { %v3161_v28 = vpack.c.bf16 %v3359_v18, %v3359_v18  ;;  %v1106_v29 = vpop.f32.mrb[49].mxu0  ;;  %v2551_v35 = vadd.f32 %v2550_v27, %v2549_v17  ;;  %v2161_v38 = vadd.f32 %v2160_v21, %v2159_v15  ;;  %v2381_v2 = vmul.f32 %v3359_v18, %v3359_v18 }
 0x14b   : > { %v3159_v36 = vpack.c.bf16 %v1106_v29, %v1106_v29  ;;  %v2162_v39 = vsel %vm2066_vm2, %v1106_v29, 0.0  ;;  %v3360_v45 = vpop.f32.mrb[50].mxu0  ;;  %v2379_v48 = vmul.f32 %v1106_v29, %v1106_v29  ;;  %v2166_v12 = vsel %vm2066_vm2, %v3359_v18, 0.0  ;;  %v4059_v29 = vpop.f32.mrb[36].mxu1 }
 0x14c   : > { %1988 = vst.msk [vmem:[%s3708_s28 + $0xc8] sm:$0xf] %vm1937_vm1, %v3161_v28  ;;  %v3162_v52 = vpack.c.bf16 %v3360_v45, %v3360_v45  ;;  %v1109_v57 = vpop.f32.mrb[51].mxu0  ;;  %v2163_v61 = vadd.f32 %v2162_v39, %v2161_v38  ;;  %v2553_v62 = vadd.f32 %v2552_v41, %v2551_v35  ;;  %v2382_v13 = vmul.f32 %v3360_v45, %v3360_v45  ;;  %v4065_v39 = vpop.f32.mrb[37].mxu1 }
 0x14d   : > { %1986 = vst.msk [vmem:[%s3708_s28 + $0xc0] sm:$0xf] %vm1937_vm1, %v3159_v36  ;;  %v3160_v1 = vpack.c.bf16 %v1109_v57, %v1109_v57  ;;  %v2554_v5 = vsel %vm2066_vm2, %v2379_v48, 0.0  ;;  %v2164_v6 = vsel %vm2066_vm2, %v1109_v57, 0.0  ;;  %v2380_v8 = vmul.f32 %v1109_v57, %v1109_v57 }
 0x14e   : > { %1989 = vst.msk [vmem:[%s3708_s28 + $0xcc] sm:$0xf] %vm1937_vm1, %v3162_v52  ;;  %v2555_v10 = vadd.f32 %v2554_v5, %v2553_v62  ;;  %v2165_v11 = vadd.f32 %v2164_v6, %v2163_v61  ;;  %v3191_v17 = vpack.c.bf16 %v3905_v9, %v3905_v9  ;;  %v3194_v28 = vpack.c.bf16 %v3910_v16, %v3910_v16  ;;  %v4070_v62 = vpop.f32.mrb[38].mxu1 }
 0x14f   : > { %1987 = vst.msk [vmem:[%s3708_s28 + $0xc4] sm:$0xf] %vm1937_vm1, %v3160_v1  ;;  %v2556_v15 = vsel %vm2066_vm2, %v2380_v8, 0.0  ;;  %v2558_v35 = vsel %vm2066_vm2, %v2381_v2, 0.0  ;;  %v2168_v18 = vsel %vm2066_vm2, %v3360_v45, 0.0  ;;  %v2560_v45 = vsel %vm2066_vm2, %v2382_v13, 0.0 }
 0x150   : > { %v2167_v20 = vadd.f32 %v2166_v12, %v2165_v11  ;;  %v2557_v27 = vadd.f32 %v2556_v15, %v2555_v10  ;;  %2018 = vst.msk [vmem:[%s3708_s28 + $0x140] sm:$0xf] %vm1937_vm1, %v3191_v17  ;;  %2021 = vst.msk [vmem:[%s3708_s28 + $0x14c] sm:$0xf] %vm1937_vm1, %v3194_v28  ;;  %v4075_v6 = vpop.f32.mrb[39].mxu1  ;;  %v2395_v16 = vmul.f32 %v3777_v49, %v3777_v49 }
 0x151   : > { %v3363_v21 = vpop.f32.mrb[52].mxu0 }
 0x152   : > { %v3165_v36 = vpack.c.bf16 %v3363_v21, %v3363_v21  ;;  %v1122_v38 = vpop.f32.mrb[53].mxu0  ;;  %v2559_v41 = vadd.f32 %v2558_v35, %v2557_v27  ;;  %v2169_v52 = vadd.f32 %v2168_v18, %v2167_v20  ;;  %v2385_v12 = vmul.f32 %v3363_v21, %v3363_v21 }
 0x153   : > { %v3163_v48 = vpack.c.bf16 %v1122_v38, %v1122_v38  ;;  %v2170_v57 = vsel %vm2066_vm2, %v1122_v38, 0.0  ;;  %v3364_v61 = vpop.f32.mrb[54].mxu0  ;;  %v2383_v1 = vmul.f32 %v1122_v38, %v1122_v38  ;;  %v2174_v28 = vsel %vm2066_vm2, %v3363_v21, 0.0 }
 0x154   : > { %1992 = vst.msk [vmem:[%s3708_s28 + $0xd8] sm:$0xf] %vm1937_vm1, %v3165_v36  ;;  %v3166_v2 = vpack.c.bf16 %v3364_v61, %v3364_v61  ;;  %v1125_v5 = vpop.f32.mrb[55].mxu0  ;;  %v2171_v8 = vadd.f32 %v2170_v57, %v2169_v52  ;;  %v2561_v10 = vadd.f32 %v2560_v45, %v2559_v41  ;;  %v2386_v35 = vmul.f32 %v3364_v61, %v3364_v61  ;;  %v4091_v57 = vpop.f32.mrb[40].mxu1 }
 0x155   : > { %1990 = vst.msk [vmem:[%s3708_s28 + $0xd0] sm:$0xf] %vm1937_vm1, %v3163_v48  ;;  %v3164_v11 = vpack.c.bf16 %v1125_v5, %v1125_v5  ;;  %v2562_v15 = vsel %vm2066_vm2, %v2383_v1, 0.0  ;;  %v2172_v13 = vsel %vm2066_vm2, %v1125_v5, 0.0  ;;  %v2384_v17 = vmul.f32 %v1125_v5, %v1125_v5  ;;  %v4097_v5 = vpop.f32.mrb[41].mxu1 }
 0x156   : > { %1993 = vst.msk [vmem:[%s3708_s28 + $0xdc] sm:$0xf] %vm1937_vm1, %v3166_v2  ;;  %v2563_v20 = vadd.f32 %v2562_v15, %v2561_v10  ;;  %v2173_v27 = vadd.f32 %v2172_v13, %v2171_v8  ;;  %v3192_v36 = vpack.c.bf16 %v3915_v22, %v3915_v22  ;;  %v3197_v52 = vpack.c.bf16 %v3931_v47, %v3931_v47 }
 0x157   : > { %1991 = vst.msk [vmem:[%s3708_s28 + $0xd4] sm:$0xf] %vm1937_vm1, %v3164_v11  ;;  %v2564_v18 = vsel %vm2066_vm2, %v2384_v17, 0.0  ;;  %v2566_v45 = vsel %vm2066_vm2, %v2385_v12, 0.0  ;;  %v2176_v21 = vsel %vm2066_vm2, %v3364_v61, 0.0  ;;  %v4102_v17 = vpop.f32.mrb[42].mxu1 }
 0x158   : > { %v2175_v38 = vadd.f32 %v2174_v28, %v2173_v27  ;;  %v2565_v41 = vadd.f32 %v2564_v18, %v2563_v20  ;;  %2019 = vst.msk [vmem:[%s3708_s28 + $0x144] sm:$0xf] %vm1937_vm1, %v3192_v36  ;;  %2024 = vst.msk [vmem:[%s3708_s28 + $0x158] sm:$0xf] %vm1937_vm1, %v3197_v52  ;;  %v2568_v61 = vsel %vm2066_vm2, %v2386_v35, 0.0  ;;  %v4107_v28 = vpop.f32.mrb[43].mxu1 }
 0x159   : > { %v3367_v48 = vpop.f32.mrb[56].mxu0 }
 0x15a   : > { %v3169_v1 = vpack.c.bf16 %v3367_v48, %v3367_v48  ;;  %v1138_v2 = vpop.f32.mrb[57].mxu0  ;;  %v2567_v8 = vadd.f32 %v2566_v45, %v2565_v41  ;;  %v2177_v11 = vadd.f32 %v2176_v21, %v2175_v38  ;;  %v2389_v41 = vmul.f32 %v3367_v48, %v3367_v48 }
 0x15b   : > { %v3167_v10 = vpack.c.bf16 %v1138_v2, %v1138_v2  ;;  %v2178_v15 = vsel %vm2066_vm2, %v1138_v2, 0.0  ;;  %v3368_v13 = vpop.f32.mrb[58].mxu0  ;;  %v2387_v12 = vmul.f32 %v1138_v2, %v1138_v2  ;;  %v2182_v2 = vsel %vm2066_vm2, %v3367_v48, 0.0 }
 0x15c   : > { %1996 = vst.msk [vmem:[%s3708_s28 + $0xe8] sm:$0xf] %vm1937_vm1, %v3169_v1  ;;  %v3170_v20 = vpack.c.bf16 %v3368_v13, %v3368_v13  ;;  %v1141_v27 = vpop.f32.mrb[59].mxu0  ;;  %v2179_v18 = vadd.f32 %v2178_v15, %v2177_v11  ;;  %v2569_v36 = vadd.f32 %v2568_v61, %v2567_v8  ;;  %v2390_v47 = vmul.f32 %v3368_v13, %v3368_v13 }
 0x15d   : > { %1994 = vst.msk [vmem:[%s3708_s28 + $0xe0] sm:$0xf] %vm1937_vm1, %v3167_v10  ;;  %v3168_v38 = vpack.c.bf16 %v1141_v27, %v1141_v27  ;;  %v2570_v52 = vsel %vm2066_vm2, %v2387_v12, 0.0  ;;  %v2180_v35 = vsel %vm2066_vm2, %v1141_v27, 0.0  ;;  %v2388_v45 = vmul.f32 %v1141_v27, %v1141_v27 }
 0x15e   : > { %1997 = vst.msk [vmem:[%s3708_s28 + $0xec] sm:$0xf] %vm1937_vm1, %v3170_v20  ;;  %v2571_v21 = vadd.f32 %v2570_v52, %v2569_v36  ;;  %v2181_v1 = vadd.f32 %v2180_v35, %v2179_v18  ;;  %v3195_v8 = vpack.c.bf16 %v3937_v54, %v3937_v54  ;;  %v3198_v12 = vpack.c.bf16 %v3942_v0, %v3942_v0  ;;  %v4123_v20 = vpop.f32.mrb[44].mxu1 }
 0x15f   : > { %1995 = vst.msk [vmem:[%s3708_s28 + $0xe4] sm:$0xf] %vm1937_vm1, %v3168_v38  ;;  %v2572_v10 = vsel %vm2066_vm2, %v2388_v45, 0.0  ;;  %v2574_v27 = vsel %vm2066_vm2, %v2389_v41, 0.0  ;;  %v2184_v48 = vsel %vm2066_vm2, %v3368_v13, 0.0  ;;  %v4129_v38 = vpop.f32.mrb[45].mxu1 }
 0x160   : > { %v2183_v11 = vadd.f32 %v2182_v2, %v2181_v1  ;;  %v2573_v15 = vadd.f32 %v2572_v10, %v2571_v21  ;;  %2022 = vst.msk [vmem:[%s3708_s28 + $0x150] sm:$0xf] %vm1937_vm1, %v3195_v8  ;;  %2025 = vst.msk [vmem:[%s3708_s28 + $0x15c] sm:$0xf] %vm1937_vm1, %v3198_v12  ;;  %v4134_v2 = vpop.f32.mrb[46].mxu1  ;;  %v2576_v13 = vsel %vm2066_vm2, %v2390_v47, 0.0 }
 0x161   : > { %v3371_v61 = vpop.f32.mrb[60].mxu0  ;;  %v4139_v0 = vpop.f32.mrb[47].mxu1 }
 0x162   : > { %v3173_v18 = vpack.c.bf16 %v3371_v61, %v3371_v61  ;;  %v1154_v36 = vpop.f32.mrb[61].mxu0  ;;  %v2575_v52 = vadd.f32 %v2574_v27, %v2573_v15  ;;  %v2185_v45 = vadd.f32 %v2184_v48, %v2183_v11  ;;  %v2393_v48 = vmul.f32 %v3371_v61, %v3371_v61 }
 0x163   : > { %v3171_v35 = vpack.c.bf16 %v1154_v36, %v1154_v36  ;;  %v2186_v21 = vsel %vm2066_vm2, %v1154_v36, 0.0  ;;  %v3372_v1 = vpop.f32.mrb[62].mxu0  ;;  %v2391_v41 = vmul.f32 %v1154_v36, %v1154_v36 }
 0x164   : > { %2000 = vst.msk [vmem:[%s3708_s28 + $0xf8] sm:$0xf] %vm1937_vm1, %v3173_v18  ;;  %v3174_v10 = vpack.c.bf16 %v3372_v1, %v3372_v1  ;;  %v1157_v8 = vpop.f32.mrb[63].mxu0  ;;  %v2187_v11 = vadd.f32 %v2186_v21, %v2185_v45  ;;  %v2577_v15 = vadd.f32 %v2576_v13, %v2575_v52  ;;  %v2394_v52 = vmul.f32 %v3372_v1, %v3372_v1 }
 0x165   : > { %1998 = vst.msk [vmem:[%s3708_s28 + $0xf0] sm:$0xf] %vm1937_vm1, %v3171_v35  ;;  %v3172_v27 = vpack.c.bf16 %v1157_v8, %v1157_v8  ;;  %v2578_v12 = vsel %vm2066_vm2, %v2391_v41, 0.0  ;;  %v2188_v47 = vsel %vm2066_vm2, %v1157_v8, 0.0  ;;  %v2392_v54 = vmul.f32 %v1157_v8, %v1157_v8  ;;  %v4157_v8 = vpop.f32.mrb[48].mxu1 }
 0x166   : > { %2001 = vst.msk [vmem:[%s3708_s28 + $0xfc] sm:$0xf] %vm1937_vm1, %v3174_v10  ;;  %v2579_v18 = vadd.f32 %v2578_v12, %v2577_v15  ;;  %v2189_v36 = vadd.f32 %v2188_v47, %v2187_v11  ;;  %v2190_v35 = vsel %vm2066_vm2, %v3371_v61, 0.0  ;;  %v3196_v21 = vpack.c.bf16 %v3947_v7, %v3947_v7 }
 0x167   : > { %1999 = vst.msk [vmem:[%s3708_s28 + $0xf4] sm:$0xf] %vm1937_vm1, %v3172_v27  ;;  %v2580_v45 = vsel %vm2066_vm2, %v2392_v54, 0.0  ;;  %v3201_v10 = vpack.c.bf16 %v3963_v34, %v3963_v34  ;;  %v2582_v11 = vsel %vm2066_vm2, %v2393_v48, 0.0  ;;  %v2192_v15 = vsel %vm2066_vm2, %v3372_v1, 0.0  ;;  %v4167_v27 = vpop.f32.mrb[49].mxu1 }
 0x168   : > { %v2191_v13 = vadd.f32 %v2190_v35, %v2189_v36  ;;  %v2581_v41 = vadd.f32 %v2580_v45, %v2579_v18  ;;  %v2194_v61 = vsel %vm2066_vm2, %v3777_v49, 0.0  ;;  %2023 = vst.msk [vmem:[%s3708_s28 + $0x154] sm:$0xf] %vm1937_vm1, %v3196_v21  ;;  %v3199_v54 = vpack.c.bf16 %v3969_v40, %v3969_v40  ;;  %v4171_v18 = vpop.f32.mrb[50].mxu1 }
 0x169   : > { %2028 = vst.msk [vmem:[%s3708_s28 + $0x168] sm:$0xf] %vm1937_vm1, %v3201_v10  ;;  %v2584_v48 = vsel %vm2066_vm2, %v2394_v52, 0.0  ;;  %v2586_v1 = vsel %vm2066_vm2, %v2395_v16, 0.0  ;;  %v2396_v49 = vmul.f32 %v3787_v60, %v3787_v60  ;;  %v3202_v36 = vpack.c.bf16 %v3974_v51, %v3974_v51  ;;  %v4181_v35 = vpop.f32.mrb[51].mxu1 }
 0x16a   : > { %v2193_v12 = vadd.f32 %v2192_v15, %v2191_v13  ;;  %v2583_v47 = vadd.f32 %v2582_v11, %v2581_v41  ;;  %2026 = vst.msk [vmem:[%s3708_s28 + $0x160] sm:$0xf] %vm1937_vm1, %v3199_v54  ;;  %v3200_v13 = vpack.c.bf16 %v3979_v59, %v3979_v59  ;;  %v2397_v52 = vmul.f32 %v3771_v43, %v3771_v43 }
 0x16b   : > { %v2196_v16 = vsel %vm2066_vm2, %v3787_v60, 0.0  ;;  %2029 = vst.msk [vmem:[%s3708_s28 + $0x16c] sm:$0xf] %vm1937_vm1, %v3202_v36  ;;  %v3205_v41 = vpack.c.bf16 %v3995_v26, %v3995_v26  ;;  %v2198_v10 = vsel %vm2066_vm2, %v3771_v43, 0.0  ;;  %v2588_v54 = vsel %vm2066_vm2, %v2396_v49, 0.0 }
 0x16c   : > { %v2585_v45 = vadd.f32 %v2584_v48, %v2583_v47  ;;  %v2195_v21 = vadd.f32 %v2194_v61, %v2193_v12  ;;  %2027 = vst.msk [vmem:[%s3708_s28 + $0x164] sm:$0xf] %vm1937_vm1, %v3200_v13  ;;  %v2398_v61 = vmul.f32 %v3780_v55, %v3780_v55  ;;  %v2399_v60 = vmul.f32 %v3809_v19, %v3809_v19 }
 0x16d   : > { %2032 = vst.msk [vmem:[%s3708_s28 + $0x178] sm:$0xf] %vm1937_vm1, %v3205_v41  ;;  %v3203_v12 = vpack.c.bf16 %v4001_v33, %v4001_v33  ;;  %v3206_v48 = vpack.c.bf16 %v4006_v44, %v4006_v44  ;;  %v2590_v36 = vsel %vm2066_vm2, %v2397_v52, 0.0  ;;  %v2200_v49 = vsel %vm2066_vm2, %v3780_v55, 0.0 }
 0x16e   : > { %v2587_v11 = vadd.f32 %v2586_v1, %v2585_v45  ;;  %v2197_v15 = vadd.f32 %v2196_v16, %v2195_v21  ;;  %v4208_v1 = vpop.f32.mrb[52].mxu1  ;;  %v2202_v45 = vsel %vm2066_vm2, %v3809_v19, 0.0  ;;  %v3204_v21 = vpack.c.bf16 %v4011_v53, %v4011_v53 }
 0x16f   : > { %2030 = vst.msk [vmem:[%s3708_s28 + $0x170] sm:$0xf] %vm1937_vm1, %v3203_v12  ;;  %v4219_v13 = vpop.f32.mrb[53].mxu1  ;;  %2033 = vst.msk [vmem:[%s3708_s28 + $0x17c] sm:$0xf] %vm1937_vm1, %v3206_v48  ;;  %v2592_v52 = vsel %vm2066_vm2, %v2398_v61, 0.0  ;;  %v2400_v19 = vmul.f32 %v3819_v30, %v3819_v30  ;;  %v2401_v61 = vmul.f32 %v3803_v14, %v3803_v14 }
 0x170   : > { %v2199_v43 = vadd.f32 %v2198_v10, %v2197_v15  ;;  %v2589_v47 = vadd.f32 %v2588_v54, %v2587_v11  ;;  %v4223_v10 = vpop.f32.mrb[54].mxu1  ;;  %v2594_v55 = vsel %vm2066_vm2, %v2399_v60, 0.0  ;;  %2031 = vst.msk [vmem:[%s3708_s28 + $0x174] sm:$0xf] %vm1937_vm1, %v3204_v21  ;;  %v3209_v11 = vpack.c.bf16 %v4027_v23, %v4027_v23 }
 0x171   : > { %v4233_v15 = vpop.f32.mrb[55].mxu1  ;;  %v2204_v60 = vsel %vm2066_vm2, %v3819_v30, 0.0  ;;  %v2206_v48 = vsel %vm2066_vm2, %v3803_v14, 0.0  ;;  %v2596_v21 = vsel %vm2066_vm2, %v2400_v19, 0.0  ;;  %v2403_v30 = vmul.f32 %v3841_v56, %v3841_v56 }
 0x172   : > { %v2591_v16 = vadd.f32 %v2590_v36, %v2589_v47  ;;  %v2201_v41 = vadd.f32 %v2200_v49, %v2199_v43  ;;  %v3207_v43 = vpack.c.bf16 %v4033_v32, %v4033_v32  ;;  %2036 = vst.msk [vmem:[%s3708_s28 + $0x188] sm:$0xf] %vm1937_vm1, %v3209_v11  ;;  %v3210_v47 = vpack.c.bf16 %v4038_v46, %v4038_v46 }
 0x173   : > { %v2598_v11 = vsel %vm2066_vm2, %v2401_v61, 0.0  ;;  %v2208_v19 = vsel %vm2066_vm2, %v3814_v25, 0.0 }
 0x174   : > { %v2203_v54 = vadd.f32 %v2202_v45, %v2201_v41  ;;  %v2593_v12 = vadd.f32 %v2592_v52, %v2591_v16  ;;  %2034 = vst.msk [vmem:[%s3708_s28 + $0x180] sm:$0xf] %vm1937_vm1, %v3207_v43  ;;  %v2402_v45 = vmul.f32 %v3814_v25, %v3814_v25  ;;  %2037 = vst.msk [vmem:[%s3708_s28 + $0x18c] sm:$0xf] %vm1937_vm1, %v3210_v47  ;;  %v2602_v25 = vsel %vm2066_vm2, %v2403_v30, 0.0 }
 0x175   : > { %v3208_v16 = vpack.c.bf16 %v4043_v58, %v4043_v58  ;;  %v3213_v52 = vpack.c.bf16 %v4059_v29, %v4059_v29  ;;  %v2212_v30 = vsel %vm2066_vm2, %v3851_v4, 0.0 }
 0x176   : > { %v2595_v36 = vadd.f32 %v2594_v55, %v2593_v12  ;;  %v2205_v49 = vadd.f32 %v2204_v60, %v2203_v54  ;;  %v4260_v55 = vpop.f32.mrb[56].mxu1  ;;  %v2210_v54 = vsel %vm2066_vm2, %v3841_v56, 0.0  ;;  %v3211_v12 = vpack.c.bf16 %v4065_v39, %v4065_v39 }
 0x177   : > { %2035 = vst.msk [vmem:[%s3708_s28 + $0x184] sm:$0xf] %vm1937_vm1, %v3208_v16  ;;  %v4271_v43 = vpop.f32.mrb[57].mxu1  ;;  %2040 = vst.msk [vmem:[%s3708_s28 + $0x198] sm:$0xf] %vm1937_vm1, %v3213_v52  ;;  %v2600_v61 = vsel %vm2066_vm2, %v2402_v45, 0.0  ;;  %v2404_v56 = vmul.f32 %v3851_v4, %v3851_v4  ;;  %v2405_v45 = vmul.f32 %v3835_v50, %v3835_v50  ;;  %v2407_v4 = vmul.f32 %v3873_v31, %v3873_v31 }
 0x178   : > { %v2207_v14 = vadd.f32 %v2206_v48, %v2205_v49  ;;  %v2597_v41 = vadd.f32 %v2596_v21, %v2595_v36  ;;  %v4275_v48 = vpop.f32.mrb[58].mxu1  ;;  %2038 = vst.msk [vmem:[%s3708_s28 + $0x190] sm:$0xf] %vm1937_vm1, %v3211_v12  ;;  %v3214_v36 = vpack.c.bf16 %v4070_v62, %v4070_v62  ;;  %v2214_v52 = vsel %vm2066_vm2, %v3835_v50, 0.0 }
 0x179   : > { %v4285_v49 = vpop.f32.mrb[59].mxu1  ;;  %v2604_v12 = vsel %vm2066_vm2, %v2404_v56, 0.0  ;;  %v2216_v56 = vsel %vm2066_vm2, %v3846_v63, 0.0 }
 0x17a   : > { %v2599_v60 = vadd.f32 %v2598_v11, %v2597_v41  ;;  %v2209_v47 = vadd.f32 %v2208_v19, %v2207_v14  ;;  %v3212_v14 = vpack.c.bf16 %v4075_v6, %v4075_v6  ;;  %2041 = vst.msk [vmem:[%s3708_s28 + $0x19c] sm:$0xf] %vm1937_vm1, %v3214_v36  ;;  %v3217_v41 = vpack.c.bf16 %v4091_v57, %v4091_v57 }
 0x17b   : > { %v2606_v36 = vsel %vm2066_vm2, %v2405_v45, 0.0 }
 0x17c   : > { %v2211_v21 = vadd.f32 %v2210_v54, %v2209_v47  ;;  %v2601_v16 = vadd.f32 %v2600_v61, %v2599_v60  ;;  %2039 = vst.msk [vmem:[%s3708_s28 + $0x194] sm:$0xf] %vm1937_vm1, %v3212_v14  ;;  %v2406_v54 = vmul.f32 %v3846_v63, %v3846_v63  ;;  %2044 = vst.msk [vmem:[%s3708_s28 + $0x1a8] sm:$0xf] %vm1937_vm1, %v3217_v41  ;;  %v2610_v63 = vsel %vm2066_vm2, %v2407_v4, 0.0 }
 0x17d   : > { %v3215_v60 = vpack.c.bf16 %v4097_v5, %v4097_v5  ;;  %v3218_v61 = vpack.c.bf16 %v4102_v17, %v4102_v17  ;;  %v2220_v4 = vsel %vm2066_vm2, %v3883_v42, 0.0 }
 0x17e   : > { %v2603_v11 = vadd.f32 %v2602_v25, %v2601_v16  ;;  %v2213_v19 = vadd.f32 %v2212_v30, %v2211_v21  ;;  %v4312_v25 = vpop.f32.mrb[60].mxu1  ;;  %v2218_v21 = vsel %vm2066_vm2, %v3873_v31, 0.0  ;;  %v3216_v16 = vpack.c.bf16 %v4107_v28, %v4107_v28 }
 0x17f   : > { %2042 = vst.msk [vmem:[%s3708_s28 + $0x1a0] sm:$0xf] %vm1937_vm1, %v3215_v60  ;;  %v4323_v14 = vpop.f32.mrb[61].mxu1  ;;  %2045 = vst.msk [vmem:[%s3708_s28 + $0x1ac] sm:$0xf] %vm1937_vm1, %v3218_v61  ;;  %v2608_v45 = vsel %vm2066_vm2, %v2406_v54, 0.0  ;;  %v2408_v31 = vmul.f32 %v3883_v42, %v3883_v42  ;;  %v2409_v54 = vmul.f32 %v3867_v24, %v3867_v24  ;;  %v2411_v42 = vmul.f32 %v3905_v9, %v3905_v9 }
 0x180   : > { %v2215_v50 = vadd.f32 %v2214_v52, %v2213_v19  ;;  %v2605_v47 = vadd.f32 %v2604_v12, %v2603_v11  ;;  %v4327_v52 = vpop.f32.mrb[62].mxu1  ;;  %2043 = vst.msk [vmem:[%s3708_s28 + $0x1a4] sm:$0xf] %vm1937_vm1, %v3216_v16  ;;  %v3221_v11 = vpack.c.bf16 %v4123_v20, %v4123_v20  ;;  %v2222_v61 = vsel %vm2066_vm2, %v3867_v24, 0.0 }
 0x181   : > { %v4337_v19 = vpop.f32.mrb[63].mxu1  ;;  %v2612_v16 = vsel %vm2066_vm2, %v2408_v31, 0.0  ;;  %v2226_v31 = vsel %vm2066_vm2, %v3905_v9, 0.0  ;;  %v3226_v9 = vpack.c.bf16 %v4171_v18, %v4171_v18 }
 0x182   : > { %v2607_v30 = vadd.f32 %v2606_v36, %v2605_v47  ;;  %v2217_v41 = vadd.f32 %v2216_v56, %v2215_v50  ;;  %v3219_v50 = vpack.c.bf16 %v4129_v38, %v4129_v38  ;;  %2048 = vst.msk [vmem:[%s3708_s28 + $0x1b8] sm:$0xf] %vm1937_vm1, %v3221_v11  ;;  %v3222_v47 = vpack.c.bf16 %v4134_v2, %v4134_v2 }
 0x183   : > { %v2224_v11 = vsel %vm2066_vm2, %v3878_v37, 0.0  ;;  %2053 = vst.msk [vmem:[%s3708_s28 + $0x1cc] sm:$0xf] %vm1937_vm1, %v3226_v9 }
 0x184   : > { %v2219_v12 = vadd.f32 %v2218_v21, %v2217_v41  ;;  %v2609_v60 = vadd.f32 %v2608_v45, %v2607_v30  ;;  %2046 = vst.msk [vmem:[%s3708_s28 + $0x1b0] sm:$0xf] %vm1937_vm1, %v3219_v50  ;;  %v2410_v21 = vmul.f32 %v3878_v37, %v3878_v37  ;;  %2049 = vst.msk [vmem:[%s3708_s28 + $0x1bc] sm:$0xf] %vm1937_vm1, %v3222_v47 }
 0x185   : > { %v3220_v30 = vpack.c.bf16 %v4139_v0, %v4139_v0  ;;  %v3225_v45 = vpack.c.bf16 %v4157_v8, %v4157_v8  ;;  %v2412_v37 = vmul.f32 %v3915_v22, %v3915_v22 }
 0x186   : > { %v2611_v36 = vadd.f32 %v2610_v63, %v2609_v60  ;;  %v2221_v56 = vadd.f32 %v2220_v4, %v2219_v12  ;;  %v2614_v63 = vsel %vm2066_vm2, %v2409_v54, 0.0  ;;  %v3223_v12 = vpack.c.bf16 %v4167_v27, %v4167_v27 }
 0x187   : > { %2047 = vst.msk [vmem:[%s3708_s28 + $0x1b4] sm:$0xf] %vm1937_vm1, %v3220_v30  ;;  %2052 = vst.msk [vmem:[%s3708_s28 + $0x1c8] sm:$0xf] %vm1937_vm1, %v3225_v45  ;;  %v2616_v4 = vsel %vm2066_vm2, %v2410_v21, 0.0  ;;  %v2618_v54 = vsel %vm2066_vm2, %v2411_v42, 0.0 }
 0x188   : > { %v2223_v24 = vadd.f32 %v2222_v61, %v2221_v56  ;;  %v2613_v41 = vadd.f32 %v2612_v16, %v2611_v36  ;;  %2050 = vst.msk [vmem:[%s3708_s28 + $0x1c0] sm:$0xf] %vm1937_vm1, %v3223_v12  ;;  %v3224_v36 = vpack.c.bf16 %v4181_v35, %v4181_v35  ;;  %v2413_v56 = vmul.f32 %v3899_v3, %v3899_v3 }
 0x189   : > { %v2228_v21 = vsel %vm2066_vm2, %v3915_v22, 0.0  ;;  %v3229_v16 = vpack.c.bf16 %v4208_v1, %v4208_v1  ;;  %v2230_v42 = vsel %vm2066_vm2, %v3899_v3, 0.0  ;;  %v4701_v22 = vld [vmem:[#allocation4_spill] sm:$0xff] }
 0x18a   : > { %v2615_v60 = vadd.f32 %v2614_v63, %v2613_v41  ;;  %v2225_v50 = vadd.f32 %v2224_v11, %v2223_v24  ;;  %2051 = vst.msk [vmem:[%s3708_s28 + $0x1c4] sm:$0xf] %vm1937_vm1, %v3224_v36  ;;  %v4700_v41 = vld [vmem:[#allocation2_spill] sm:$0xff]  ;;  %v2620_v63 = vsel %vm2066_vm2, %v2412_v37, 0.0  ;;  %v2415_v11 = vmul.f32 %v4701_v22, %v4701_v22 }
 0x18b   : > { %v2414_v45 = vmul.f32 %v4700_v41, %v4700_v41  ;;  %2056 = vst.msk [vmem:[%s3708_s28 + $0x1d8] sm:$0xf] %vm1937_vm1, %v3229_v16  ;;  %v3228_v37 = vpack.c.bf16 %v4233_v15, %v4233_v15 }
 0x18c   : > { %v2227_v47 = vadd.f32 %v2226_v31, %v2225_v50  ;;  %v2617_v61 = vadd.f32 %v2616_v4, %v2615_v60  ;;  %v3227_v31 = vpack.c.bf16 %v4219_v13, %v4219_v13  ;;  %v3230_v60 = vpack.c.bf16 %v4223_v10, %v4223_v10 }
 0x18d   : > { %v2622_v50 = vsel %vm2066_vm2, %v2413_v56, 0.0  ;;  %v2232_v4 = vsel %vm2066_vm2, %v4700_v41, 0.0  ;;  %v2626_v36 = vsel %vm2066_vm2, %v2415_v11, 0.0  ;;  %v2416_v56 = vmul.f32 %v3947_v7, %v3947_v7  ;;  %2055 = vst.msk [vmem:[%s3708_s28 + $0x1d4] sm:$0xf] %vm1937_vm1, %v3228_v37 }
 0x18e   : > { %v2619_v30 = vadd.f32 %v2618_v54, %v2617_v61  ;;  %v2229_v24 = vadd.f32 %v2228_v21, %v2227_v47  ;;  %v2234_v54 = vsel %vm2066_vm2, %v4701_v22, 0.0  ;;  %2054 = vst.msk [vmem:[%s3708_s28 + $0x1d0] sm:$0xf] %vm1937_vm1, %v3227_v31  ;;  %2057 = vst.msk [vmem:[%s3708_s28 + $0x1dc] sm:$0xf] %vm1937_vm1, %v3230_v60  ;;  %v2624_v61 = vsel %vm2066_vm2, %v2414_v45, 0.0 }
 0x18f   : > { %v3233_v21 = vpack.c.bf16 %v4260_v55, %v4260_v55  ;;  %v2236_v45 = vsel %vm2066_vm2, %v3947_v7, 0.0  ;;  %v2628_v60 = vsel %vm2066_vm2, %v2416_v56, 0.0  ;;  %v2419_v7 = vmul.f32 %v3969_v40, %v3969_v40 }
 0x190   : > { %v2231_v3 = vadd.f32 %v2230_v42, %v2229_v24  ;;  %v2621_v12 = vadd.f32 %v2620_v63, %v2619_v30  ;;  %v3231_v30 = vpack.c.bf16 %v4271_v43, %v4271_v43  ;;  %v4702_v24 = vld [vmem:[#allocation3_spill] sm:$0xff]  ;;  %v3234_v63 = vpack.c.bf16 %v4275_v48, %v4275_v48 }
 0x191   : > { %v2417_v41 = vmul.f32 %v4702_v24, %v4702_v24  ;;  %2060 = vst.msk [vmem:[%s3708_s28 + $0x1e8] sm:$0xf] %vm1937_vm1, %v3233_v21  ;;  %v2238_v22 = vsel %vm2066_vm2, %v4702_v24, 0.0  ;;  %v3237_v37 = vpack.c.bf16 %v4312_v25, %v4312_v25 }
 0x192   : > { %v2623_v9 = vadd.f32 %v2622_v50, %v2621_v12  ;;  %v2233_v47 = vadd.f32 %v2232_v4, %v2231_v3  ;;  %2058 = vst.msk [vmem:[%s3708_s28 + $0x1e0] sm:$0xf] %vm1937_vm1, %v3231_v30  ;;  %v4703_v3 = vld [vmem:[#allocation5_spill] sm:$0xff]  ;;  %2061 = vst.msk [vmem:[%s3708_s28 + $0x1ec] sm:$0xf] %vm1937_vm1, %v3234_v63  ;;  %v3232_v50 = vpack.c.bf16 %v4285_v49, %v4285_v49 }
 0x193   : > { %v2418_v12 = vmul.f32 %v4703_v3, %v4703_v3  ;;  %2064 = vst.msk [vmem:[%s3708_s28 + $0x1f8] sm:$0xf] %vm1937_vm1, %v3237_v37  ;;  %v2420_v30 = vmul.f32 %v3979_v59, %v3979_v59  ;;  %v2421_v63 = vmul.f32 %v3963_v34, %v3963_v34  ;;  %v2250_v37 = vsel %vm2066_vm2, %v4001_v33, 0.0 }
 0x194   : > { %v2235_v16 = vadd.f32 %v2234_v54, %v2233_v47  ;;  %v2625_v42 = vadd.f32 %v2624_v61, %v2623_v9  ;;  %v2630_v9 = vsel %vm2066_vm2, %v2417_v41, 0.0  ;;  %v2240_v47 = vsel %vm2066_vm2, %v4703_v3, 0.0  ;;  %2059 = vst.msk [vmem:[%s3708_s28 + $0x1e4] sm:$0xf] %vm1937_vm1, %v3232_v50 }
 0x195   : > { %v2242_v61 = vsel %vm2066_vm2, %v3969_v40, 0.0  ;;  %v3238_v40 = vpack.c.bf16 %v4327_v52, %v4327_v52  ;;  %v2246_v3 = vsel %vm2066_vm2, %v3963_v34, 0.0 }
 0x196   : > { %v2627_v11 = vadd.f32 %v2626_v36, %v2625_v42  ;;  %v2237_v31 = vadd.f32 %v2236_v45, %v2235_v16  ;;  %v3235_v36 = vpack.c.bf16 %v4323_v14, %v4323_v14  ;;  %v2632_v16 = vsel %vm2066_vm2, %v2418_v12, 0.0 }
 0x197   : > { %v2634_v42 = vsel %vm2066_vm2, %v2419_v7, 0.0  ;;  %v3236_v45 = vpack.c.bf16 %v4337_v19, %v4337_v19  ;;  %2065 = vst.msk [vmem:[%s3708_s28 + $0x1fc] sm:$0xf] %vm1937_vm1, %v3238_v40  ;;  %v2422_v12 = vmul.f32 %v3974_v51, %v3974_v51  ;;  %v2423_v7 = vmul.f32 %v4001_v33, %v4001_v33 }
 0x198   : > { %v2239_v4 = vadd.f32 %v2238_v22, %v2237_v31  ;;  %v2629_v54 = vadd.f32 %v2628_v60, %v2627_v11  ;;  %2062 = vst.msk [vmem:[%s3708_s28 + $0x1f0] sm:$0xf] %vm1937_vm1, %v3235_v36  ;;  %v2244_v22 = vsel %vm2066_vm2, %v3979_v59, 0.0  ;;  %v2636_v60 = vsel %vm2066_vm2, %v2420_v30, 0.0 }
 0x199   : > { %2063 = vst.msk [vmem:[%s3708_s28 + $0x1f4] sm:$0xf] %vm1937_vm1, %v3236_v45  ;;  %v2638_v59 = vsel %vm2066_vm2, %v2421_v63, 0.0  ;;  %v2424_v36 = vmul.f32 %v4011_v53, %v4011_v53  ;;  %v2254_v33 = vsel %vm2066_vm2, %v3995_v26, 0.0  ;;  %v2426_v40 = vmul.f32 %v4006_v44, %v4006_v44 }
 0x19a   : > { %v2631_v56 = vadd.f32 %v2630_v9, %v2629_v54  ;;  %v2241_v21 = vadd.f32 %v2240_v47, %v2239_v4  ;;  %v2248_v54 = vsel %vm2066_vm2, %v3974_v51, 0.0  ;;  %v2640_v47 = vsel %vm2066_vm2, %v2422_v12, 0.0 }
 0x19b   : > { %v2252_v51 = vsel %vm2066_vm2, %v4011_v53, 0.0  ;;  %v2256_v53 = vsel %vm2066_vm2, %v4006_v44, 0.0  ;;  %v2260_v44 = vsel %vm2066_vm2, %v4043_v58, 0.0 }
 0x19c   : > { %v2243_v24 = vadd.f32 %v2242_v61, %v2241_v21  ;;  %v2633_v41 = vadd.f32 %v2632_v16, %v2631_v56  ;;  %v2642_v61 = vsel %vm2066_vm2, %v2423_v7, 0.0  ;;  %v2425_v16 = vmul.f32 %v3995_v26, %v3995_v26 }
 0x19e   : > { %v2635_v11 = vadd.f32 %v2634_v42, %v2633_v41  ;;  %v2245_v31 = vadd.f32 %v2244_v22, %v2243_v24  ;;  %v2644_v24 = vsel %vm2066_vm2, %v2424_v36, 0.0  ;;  %v2427_v41 = vmul.f32 %v4033_v32, %v4033_v32 }
 0x19f   : > { %v2646_v22 = vsel %vm2066_vm2, %v2425_v16, 0.0 }
 0x1a0   : > { %v2247_v50 = vadd.f32 %v2246_v3, %v2245_v31  ;;  %v2637_v4 = vadd.f32 %v2636_v60, %v2635_v11  ;;  %v2258_v11 = vsel %vm2066_vm2, %v4033_v32, 0.0  ;;  %v2648_v3 = vsel %vm2066_vm2, %v2426_v40, 0.0 }
 0x1a1   : > { %v2650_v12 = vsel %vm2066_vm2, %v2427_v41, 0.0  ;;  %v2428_v60 = vmul.f32 %v4043_v58, %v4043_v58  ;;  %v2262_v32 = vsel %vm2066_vm2, %v4027_v23, 0.0  ;;  %v2264_v58 = vsel %vm2066_vm2, %v4038_v46, 0.0 }
 0x1a2   : > { %v2639_v9 = vadd.f32 %v2638_v59, %v2637_v4  ;;  %v2249_v34 = vadd.f32 %v2248_v54, %v2247_v50  ;;  %v2429_v4 = vmul.f32 %v4027_v23, %v4027_v23  ;;  %v2433_v40 = vmul.f32 %v4059_v29, %v4059_v29 }
 0x1a4   : > { %v2251_v56 = vadd.f32 %v2250_v37, %v2249_v34  ;;  %v2641_v21 = vadd.f32 %v2640_v47, %v2639_v9  ;;  %v2430_v37 = vmul.f32 %v4038_v46, %v4038_v46  ;;  %v2652_v9 = vsel %vm2066_vm2, %v2428_v60, 0.0 }
 0x1a5   : > { %v2431_v34 = vmul.f32 %v4065_v39, %v4065_v39  ;;  %v2654_v36 = vsel %vm2066_vm2, %v2429_v4, 0.0  ;;  %v2268_v46 = vsel %vm2066_vm2, %v4075_v6, 0.0 }
 0x1a6   : > { %v2643_v42 = vadd.f32 %v2642_v61, %v2641_v21  ;;  %v2253_v30 = vadd.f32 %v2252_v51, %v2251_v56  ;;  %v2266_v56 = vsel %vm2066_vm2, %v4065_v39, 0.0  ;;  %v2656_v16 = vsel %vm2066_vm2, %v2430_v37, 0.0 }
 0x1a7   : > { %v2658_v51 = vsel %vm2066_vm2, %v2431_v34, 0.0  ;;  %v2270_v39 = vsel %vm2066_vm2, %v4059_v29, 0.0 }
 0x1a8   : > { %v2255_v45 = vadd.f32 %v2254_v33, %v2253_v30  ;;  %v2645_v63 = vadd.f32 %v2644_v24, %v2643_v42  ;;  %v2432_v42 = vmul.f32 %v4075_v6, %v4075_v6  ;;  %v2272_v6 = vsel %vm2066_vm2, %v4070_v62, 0.0 }
 0x1aa   : > { %v2647_v31 = vadd.f32 %v2646_v22, %v2645_v63  ;;  %v2257_v26 = vadd.f32 %v2256_v53, %v2255_v45  ;;  %v2434_v45 = vmul.f32 %v4070_v62, %v4070_v62  ;;  %v2660_v63 = vsel %vm2066_vm2, %v2432_v42, 0.0 }
 0x1ab   : > { %v2435_v22 = vmul.f32 %v4097_v5, %v4097_v5  ;;  %v2276_v62 = vsel %vm2066_vm2, %v4107_v28, 0.0  ;;  %v2441_v42 = vmul.f32 %v4123_v20, %v4123_v20 }
 0x1ac   : > { %v2259_v7 = vadd.f32 %v2258_v11, %v2257_v26  ;;  %v2649_v50 = vadd.f32 %v2648_v3, %v2647_v31  ;;  %v2662_v31 = vsel %vm2066_vm2, %v2433_v40, 0.0  ;;  %v2274_v26 = vsel %vm2066_vm2, %v4097_v5, 0.0 }
 0x1ad   : > { %v2666_v60 = vsel %vm2066_vm2, %v2435_v22, 0.0  ;;  %v2278_v5 = vsel %vm2066_vm2, %v4091_v57, 0.0  ;;  %v2442_v40 = vmul.f32 %v4134_v2, %v4134_v2 }
 0x1ae   : > { %v2651_v59 = vadd.f32 %v2650_v12, %v2649_v50  ;;  %v2261_v54 = vadd.f32 %v2260_v44, %v2259_v7  ;;  %v2664_v12 = vsel %vm2066_vm2, %v2434_v45, 0.0  ;;  %v2436_v7 = vmul.f32 %v4107_v28, %v4107_v28 }
 0x1af   : > { %v2437_v44 = vmul.f32 %v4091_v57, %v4091_v57  ;;  %v2280_v28 = vsel %vm2066_vm2, %v4102_v17, 0.0  ;;  %v2678_v45 = vsel %vm2066_vm2, %v2441_v42, 0.0 }
 0x1b0   : > { %v2263_v47 = vadd.f32 %v2262_v32, %v2261_v54  ;;  %v2653_v61 = vadd.f32 %v2652_v9, %v2651_v59  ;;  %v2438_v32 = vmul.f32 %v4102_v17, %v4102_v17  ;;  %v2668_v37 = vsel %vm2066_vm2, %v2436_v7, 0.0 }
 0x1b1   : > { %v2439_v9 = vmul.f32 %v4129_v38, %v4129_v38  ;;  %v2284_v17 = vsel %vm2066_vm2, %v4139_v0, 0.0 }
 0x1b2   : > { %v2655_v21 = vadd.f32 %v2654_v36, %v2653_v61  ;;  %v2265_v23 = vadd.f32 %v2264_v58, %v2263_v47  ;;  %v2670_v61 = vsel %vm2066_vm2, %v2437_v44, 0.0  ;;  %v2282_v36 = vsel %vm2066_vm2, %v4129_v38, 0.0 }
 0x1b3   : > { %v2286_v38 = vsel %vm2066_vm2, %v4123_v20, 0.0 }
 0x1b4   : > { %v2267_v30 = vadd.f32 %v2266_v56, %v2265_v23  ;;  %v2657_v33 = vadd.f32 %v2656_v16, %v2655_v21  ;;  %v2672_v56 = vsel %vm2066_vm2, %v2438_v32, 0.0  ;;  %v2674_v21 = vsel %vm2066_vm2, %v2439_v9, 0.0 }
 0x1b5   : > { %v2440_v23 = vmul.f32 %v4139_v0, %v4139_v0  ;;  %v2288_v0 = vsel %vm2066_vm2, %v4134_v2, 0.0  ;;  %v2292_v2 = vsel %vm2066_vm2, %v4181_v35, 0.0 }
 0x1b6   : > { %v2659_v24 = vadd.f32 %v2658_v51, %v2657_v33  ;;  %v2269_v41 = vadd.f32 %v2268_v46, %v2267_v30 }
 0x1b7   : > { %v2676_v46 = vsel %vm2066_vm2, %v2440_v23, 0.0 }
 0x1b8   : > { %v2271_v53 = vadd.f32 %v2270_v39, %v2269_v41  ;;  %v2661_v11 = vadd.f32 %v2660_v63, %v2659_v24  ;;  %v2443_v24 = vmul.f32 %v4167_v27, %v4167_v27  ;;  %v2290_v63 = vsel %vm2066_vm2, %v4167_v27, 0.0 }
 0x1b9   : > { %v2294_v27 = vsel %vm2066_vm2, %v4157_v8, 0.0 }
 0x1ba   : > { %v2663_v3 = vadd.f32 %v2662_v31, %v2661_v11  ;;  %v2273_v29 = vadd.f32 %v2272_v6, %v2271_v53  ;;  %v2680_v53 = vsel %vm2066_vm2, %v2442_v40, 0.0  ;;  %v2682_v11 = vsel %vm2066_vm2, %v2443_v24, 0.0 }
 0x1bb   : > { %v2444_v31 = vmul.f32 %v4181_v35, %v4181_v35  ;;  %v2296_v35 = vsel %vm2066_vm2, %v4171_v18, 0.0  ;;  %v2453_v40 = vmul.f32 %v4260_v55, %v4260_v55 }
 0x1bc   : > { %v2275_v50 = vadd.f32 %v2274_v26, %v2273_v29  ;;  %v2665_v4 = vadd.f32 %v2664_v12, %v2663_v3  ;;  %v2445_v3 = vmul.f32 %v4157_v8, %v4157_v8 }
 0x1bd   : > { %v2684_v7 = vsel %vm2066_vm2, %v2444_v31, 0.0 }
 0x1be   : > { %v2667_v59 = vadd.f32 %v2666_v60, %v2665_v4  ;;  %v2277_v54 = vadd.f32 %v2276_v62, %v2275_v50  ;;  %v2446_v60 = vmul.f32 %v4171_v18, %v4171_v18  ;;  %v2447_v50 = vmul.f32 %v4219_v13, %v4219_v13 }
 0x1bf   : > { %v2686_v62 = vsel %vm2066_vm2, %v2445_v3, 0.0  ;;  %v2300_v18 = vsel %vm2066_vm2, %v4233_v15, 0.0 }
 0x1c0   : > { %v2279_v34 = vadd.f32 %v2278_v5, %v2277_v54  ;;  %v2669_v47 = vadd.f32 %v2668_v37, %v2667_v59  ;;  %v2298_v59 = vsel %vm2066_vm2, %v4219_v13, 0.0  ;;  %v2688_v5 = vsel %vm2066_vm2, %v2446_v60, 0.0 }
 0x1c1   : > { %v2690_v32 = vsel %vm2066_vm2, %v2447_v50, 0.0  ;;  %v2448_v37 = vmul.f32 %v4233_v15, %v4233_v15  ;;  %v2302_v13 = vsel %vm2066_vm2, %v4208_v1, 0.0  ;;  %v2304_v15 = vsel %vm2066_vm2, %v4223_v10, 0.0 }
 0x1c2   : > { %v2671_v58 = vadd.f32 %v2670_v61, %v2669_v47  ;;  %v2281_v57 = vadd.f32 %v2280_v28, %v2279_v34  ;;  %v2449_v47 = vmul.f32 %v4208_v1, %v4208_v1 }
 0x1c4   : > { %v2283_v16 = vadd.f32 %v2282_v36, %v2281_v57  ;;  %v2673_v51 = vadd.f32 %v2672_v56, %v2671_v58  ;;  %v2450_v36 = vmul.f32 %v4223_v10, %v4223_v10  ;;  %v2692_v58 = vsel %vm2066_vm2, %v2448_v37, 0.0 }
 0x1c5   : > { %v2451_v57 = vmul.f32 %v4271_v43, %v4271_v43  ;;  %v2694_v23 = vsel %vm2066_vm2, %v2449_v47, 0.0  ;;  %v2308_v10 = vsel %vm2066_vm2, %v4285_v49, 0.0 }
 0x1c6   : > { %v2675_v30 = vadd.f32 %v2674_v21, %v2673_v51  ;;  %v2285_v33 = vadd.f32 %v2284_v17, %v2283_v16  ;;  %v2306_v16 = vsel %vm2066_vm2, %v4271_v43, 0.0  ;;  %v2696_v42 = vsel %vm2066_vm2, %v2450_v36, 0.0 }
 0x1c7   : > { %v2698_v17 = vsel %vm2066_vm2, %v2451_v57, 0.0  ;;  %v2310_v43 = vsel %vm2066_vm2, %v4260_v55, 0.0 }
 0x1c8   : > { %v2287_v41 = vadd.f32 %v2286_v38, %v2285_v33  ;;  %v2677_v39 = vadd.f32 %v2676_v46, %v2675_v30  ;;  %v2452_v30 = vmul.f32 %v4285_v49, %v4285_v49  ;;  %v2312_v49 = vsel %vm2066_vm2, %v4275_v48, 0.0 }
 0x1ca   : > { %v2679_v22 = vadd.f32 %v2678_v45, %v2677_v39  ;;  %v2289_v20 = vadd.f32 %v2288_v0, %v2287_v41  ;;  %v2454_v41 = vmul.f32 %v4275_v48, %v4275_v48  ;;  %v2700_v39 = vsel %vm2066_vm2, %v2452_v30, 0.0 }
 0x1cb   : > { %v2455_v45 = vmul.f32 %v4323_v14, %v4323_v14  ;;  %v2316_v48 = vsel %vm2066_vm2, %v4337_v19, 0.0 }
 0x1cc   : > { %v2291_v6 = vadd.f32 %v2290_v63, %v2289_v20  ;;  %v2681_v26 = vadd.f32 %v2680_v53, %v2679_v22  ;;  %v2702_v22 = vsel %vm2066_vm2, %v2453_v40, 0.0  ;;  %v2314_v20 = vsel %vm2066_vm2, %v4323_v14, 0.0 }
 0x1cd   : > { %v2706_v31 = vsel %vm2066_vm2, %v2455_v45, 0.0 }
 0x1ce   : > { %v2683_v29 = vadd.f32 %v2682_v11, %v2681_v26  ;;  %v2293_v12 = vadd.f32 %v2292_v2, %v2291_v6  ;;  %v2704_v11 = vsel %vm2066_vm2, %v2454_v41, 0.0  ;;  %v2456_v6 = vmul.f32 %v4337_v19, %v4337_v19 }
 0x1cf   : > { %v2457_v2 = vmul.f32 %v4312_v25, %v4312_v25 }
 0x1d0   : > { %v2295_v4 = vadd.f32 %v2294_v27, %v2293_v12  ;;  %v2685_v44 = vadd.f32 %v2684_v7, %v2683_v29  ;;  %v2318_v12 = vsel %vm2066_vm2, %v4312_v25, 0.0  ;;  %v2458_v27 = vmul.f32 %v4327_v52, %v4327_v52 }
 0x1d1   : > { %v2708_v60 = vsel %vm2066_vm2, %v2456_v6, 0.0 }
 0x1d2   : > { %v2687_v54 = vadd.f32 %v2686_v62, %v2685_v44  ;;  %v2297_v8 = vadd.f32 %v2296_v35, %v2295_v4  ;;  %v2710_v4 = vsel %vm2066_vm2, %v2457_v2, 0.0  ;;  %v2320_v44 = vsel %vm2066_vm2, %v4327_v52, 0.0 }
 0x1d3   : > { %v2712_v35 = vsel %vm2066_vm2, %v2458_v27, 0.0 }
 0x1d4   : > { %v2299_v9 = vadd.f32 %v2298_v59, %v2297_v8  ;;  %v2689_v34 = vadd.f32 %v2688_v5, %v2687_v54 }
 0x1d6   : > { %v2691_v61 = vadd.f32 %v2690_v32, %v2689_v34  ;;  %v2301_v28 = vadd.f32 %v2300_v18, %v2299_v9 }
 0x1d8   : > { %v2303_v56 = vadd.f32 %v2302_v13, %v2301_v28  ;;  %v2693_v21 = vadd.f32 %v2692_v58, %v2691_v61 }
 0x1da   : > { %v2695_v51 = vadd.f32 %v2694_v23, %v2693_v21  ;;  %v2305_v1 = vadd.f32 %v2304_v15, %v2303_v56 }
 0x1dc   : > { %v2307_v33 = vadd.f32 %v2306_v16, %v2305_v1  ;;  %v2697_v38 = vadd.f32 %v2696_v42, %v2695_v51 }
 0x1de   : > { %v2699_v46 = vadd.f32 %v2698_v17, %v2697_v38  ;;  %v2309_v24 = vadd.f32 %v2308_v10, %v2307_v33 }
 0x1e0   : > { %v2311_v0 = vadd.f32 %v2310_v43, %v2309_v24  ;;  %v2701_v63 = vadd.f32 %v2700_v39, %v2699_v46 }
 0x1e2   : > { %v2703_v53 = vadd.f32 %v2702_v22, %v2701_v63  ;;  %v2313_v55 = vadd.f32 %v2312_v49, %v2311_v0 }
 0x1e4   : > { %v2315_v26 = vadd.f32 %v2314_v20, %v2313_v55  ;;  %v2705_v3 = vadd.f32 %v2704_v11, %v2703_v53 }
 0x1e6   : > { %v2707_v29 = vadd.f32 %v2706_v31, %v2705_v3  ;;  %v2317_v14 = vadd.f32 %v2316_v48, %v2315_v26 }
 0x1e8   : > { %v2319_v7 = vadd.f32 %v2318_v12, %v2317_v14  ;;  %v2709_v50 = vadd.f32 %v2708_v60, %v2707_v29 }
 0x1ea   : > { %v2321_v62 = vadd.f32 %v2320_v44, %v2319_v7  ;;  %v2711_v19 = vadd.f32 %v2710_v4, %v2709_v50 }
 0x1ec   : > { %v2322_v59 = vrot.slane %v2321_v62, 4  ;;  %v2713_v54 = vadd.f32 %v2712_v35, %v2711_v19 }
 0x1ee   : > { %v2323_v25 = vadd.f32 %v2322_v59, %v2321_v62  ;;  %v2714_v8 = vrot.slane %v2713_v54, 4 }
 0x1f0   : > { %v2324_v5 = vrot.slane %v2323_v25, 2  ;;  %v2715_v32 = vadd.f32 %v2714_v8, %v2713_v54 }
 0x1f2   : > { %v2325_v37 = vadd.f32 %v2324_v5, %v2323_v25  ;;  %v2716_v9 = vrot.slane %v2715_v32, 2 }
 0x1f4   : > { %v2326_v34 = vrot.slane %v2325_v37, 1  ;;  %v2717_v47 = vadd.f32 %v2716_v9, %v2715_v32 }
 0x1f6   : > { %v2327_v52 = vadd.f32 %v2326_v34, %v2325_v37  ;;  %v2718_v18 = vrot.slane %v2717_v47, 1 }
 0x1f8   : > { %v2329_v61 = vsel %vm2328_vm3, %v2327_v52, 0.0  ;;  %v2719_v28 = vadd.f32 %v2718_v18, %v2717_v47 }
 0x1f9   : > { %2330 = vst.msk [vmem:[%s217_s6] sm:$0xff] %vm2066_vm2, %v2329_v61 }
 0x1fa   : > { %v2720_v13 = vsel %vm2328_vm3, %v2719_v28, 0.0 }
 0x1fb   : > { %2721 = vst.msk [vmem:[%s221_s9] sm:$0xff] %vm2066_vm2, %v2720_v13 }
 0x1fc PF: > { %s15_s15 = sadd.s32 1, %s3521_s15  }
 0x1fd   : > { %p12_p5 = scmp.ge.s32.totalorder %s15_s15, 10  }
 0x1ff   :  { %14 = sbr.rel (!%p12_p5) target bundleno = 1 (0x1), region = 82 }

</bundles_post_ra>
